<compile_context>
chip_gen: v7x
topology: tpu7x:2x2x1
jax: 0.10.0
libtpu: 0.0.40
codegen_flags: <defaults>
</compile_context>

<pallas_src>
import jax
import jax.numpy as jnp
from jax import lax
from jax.experimental import pallas as pl
from jax.experimental.pallas import tpu as pltpu


K1P = 8  # conv1 im2col tap dim (3 real taps, zero-padded to 8 sublanes)


def _elu(v):
    # torch.nn.ELU(alpha=1.0); exp(min(v,0)) - 1 stays on guaranteed-lowering ops.
    return jnp.where(v > 0.0, v, jnp.exp(jnp.minimum(v, 0.0)) - 1.0)


def _round_up(n, m):
    return ((n + m - 1) // m) * m


# ----------------------------------------------------------------------------------
# Kernel: one batch tile (block_b rows) per grid step; all weights resident in VMEM.
# Every channel axis arriving here is already zero-padded to a multiple of 128 lanes.
# ----------------------------------------------------------------------------------
def base_cnn_kernel(xcol_ref, w1_ref, b1_ref, w2_ref, b2_ref,
                    wf1_ref, bf1_ref, wf2_ref, bf2_ref, wf3_ref, bf3_ref,
                    out_ref):
    f32 = jnp.float32
    xcol = xcol_ref[...]                       # (TB, L, 8): host-side im2col of conv1
    TB, L, KP = xcol.shape
    C1P = w1_ref.shape[1]                      # conv1 out channels, padded to 128
    C2P = w2_ref.shape[1] // 3                 # conv2 out channels, padded to 128
    L2 = L // 2
    L4 = L2 // 2

    # ---- conv1: Conv1d(1 -> C1, k=3, p=1) as a single MXU dot over im2col taps ----
    y1 = jnp.dot(xcol.reshape(TB * L, KP), w1_ref[...],
                 preferred_element_type=f32)                        # (TB*L, C1P)
    h1 = jnp.maximum(y1 + b1_ref[...], 0.0)                         # bias + ReLU
    h1 = h1.reshape(TB, L, C1P)

    # ---- MaxPool1d(2, 2): merge row pairs into lanes, aligned 128-lane slab max ----
    if L % 2:                                   # floor-mode pooling (drop last row)
        h1 = h1[:, :2 * L2, :]
    h1r = h1.reshape(TB, L2, 2 * C1P)
    h1p = jnp.maximum(h1r[:, :, :C1P], h1r[:, :, C1P:])             # (TB, L2, C1P)

    # ---- conv2: Conv1d(C1 -> C2, k=3, p=1) — one MXU dot, 3 taps fused along N ----
    # w2 columns: tap*C2P + c2, each tap in its own 128-aligned slab.
    y2 = jnp.dot(h1p.reshape(TB * L2, C1P), w2_ref[...],
                 preferred_element_type=f32)                        # (TB*L2, 3*C2P)
    y2 = y2.reshape(TB, L2, 3 * C2P)
    # out[j] = tap0 @ h[j-1] + tap1 @ h[j] + tap2 @ h[j+1]  (zero outside [0, L2))
    t1 = y2[:, :, C2P:2 * C2P]
    if L2 > 1:
        zrow = jnp.zeros((TB, 1, C2P), f32)
        t0s = jnp.concatenate([zrow, y2[:, :L2 - 1, 0:C2P]], axis=1)
        t2s = jnp.concatenate([y2[:, 1:, 2 * C2P:3 * C2P], zrow], axis=1)
        h2 = t0s + t1 + t2s
    else:
        h2 = t1
    h2 = jnp.maximum(h2 + b2_ref[...], 0.0)                         # (TB, L2, C2P)

    # ---- MaxPool1d(2, 2) ----
    if L2 % 2:
        h2 = h2[:, :2 * L4, :]
    h2r = h2.reshape(TB, L4, 2 * C2P)
    h2p = jnp.maximum(h2r[:, :, :C2P], h2r[:, :, C2P:])             # (TB, L4, C2P)

    # ---- flatten + FC head (dropout = identity in eval) ----
    # feat layout is (l-major, 128-wide channel slab minor); wf1 is pre-permuted/padded.
    feat = h2p.reshape(TB, L4 * C2P)
    z = _elu(jnp.dot(feat, wf1_ref[...], preferred_element_type=f32) + bf1_ref[...])
    z = _elu(jnp.dot(z, wf2_ref[...], preferred_element_type=f32) + bf2_ref[...])
    out_ref[...] = jnp.dot(z, wf3_ref[...], preferred_element_type=f32) + bf3_ref[...]


# ----------------------------------------------------------------------------------
# Parameter init (torch-default-style) and one-time packing into kernel layout.
# ----------------------------------------------------------------------------------
def init_params(key, num_classes, num_columns, window_size=1,
                num_cnn_units=32, num_fc_units=128):
    L = window_size * num_columns
    C1, C2 = num_cnn_units, num_cnn_units // 2
    L4 = (L // 2) // 2
    F = C2 * L4
    ks = jax.random.split(key, 10)

    def u(k, shape, fan_in):
        b = 1.0 / (fan_in ** 0.5)
        return jax.random.uniform(k, shape, jnp.float32, -b, b)

    return dict(
        conv1_w=u(ks[0], (C1, 1, 3), 1 * 3),
        conv1_b=u(ks[1], (C1,), 1 * 3),
        conv2_w=u(ks[2], (C2, C1, 3), C1 * 3),
        conv2_b=u(ks[3], (C2,), C1 * 3),
        fc1_w=u(ks[4], (num_fc_units, F), F),
        fc1_b=u(ks[5], (num_fc_units,), F),
        fc2_w=u(ks[6], (num_fc_units // 2, num_fc_units), num_fc_units),
        fc2_b=u(ks[7], (num_fc_units // 2,), num_fc_units),
        fc3_w=u(ks[8], (num_classes, num_fc_units // 2), num_fc_units // 2),
        fc3_b=u(ks[9], (num_classes,), num_fc_units // 2),
    )


def pack_params(p):
    """One-time repack of torch-layout params into the lane-dense kernel layout."""
    C1 = p['conv1_w'].shape[0]
    C2 = p['conv2_w'].shape[0]
    num_fc = p['fc1_w'].shape[0]
    nfc2 = p['fc2_w'].shape[0]
    num_classes = p['fc3_w'].shape[0]
    F = p['fc1_w'].shape[1]
    L4 = F // C2

    C1P = _round_up(C1, 128)
    C2P = _round_up(C2, 128)
    NF1 = _round_up(num_fc, 128)
    NF2 = _round_up(nfc2, 128)
    NCP = _round_up(max(num_classes, 128), 128)

    f32 = jnp.float32
    # conv1: (8, C1P) tap-major (matches host-side im2col K dim), zero-padded.
    w1 = jnp.zeros((K1P, C1P), f32).at[:3, :C1].set(
        jnp.transpose(p['conv1_w'][:, 0, :], (1, 0)))
    b1 = jnp.zeros((1, C1P), f32).at[0, :C1].set(p['conv1_b'])

    # conv2: taps fused along N, each in its own 128-aligned slab: (C1P, 3*C2P).
    w2t = jnp.transpose(p['conv2_w'], (1, 2, 0))            # (C1, 3, C2)
    w2 = jnp.zeros((C1P, 3 * C2P), f32)
    for k in range(3):
        w2 = w2.at[:C1, k * C2P:k * C2P + C2].set(w2t[:, k, :])
    b2 = jnp.zeros((1, C2P), f32).at[0, :C2].set(p['conv2_b'])

    # fc1: rows follow the kernel flatten order (l * C2P + c); torch order is c*L4 + l.
    wf1_t = p['fc1_w'].reshape(num_fc, C2, L4).transpose(2, 1, 0)   # (L4, C2, num_fc)
    wf1 = jnp.zeros((L4, C2P, NF1), f32).at[:, :C2, :num_fc].set(wf1_t)
    wf1 = wf1.reshape(L4 * C2P, NF1)
    bf1 = jnp.zeros((1, NF1), f32).at[0, :num_fc].set(p['fc1_b'])

    wf2 = jnp.zeros((NF1, NF2), f32).at[:num_fc, :nfc2].set(p['fc2_w'].T)
    bf2 = jnp.zeros((1, NF2), f32).at[0, :nfc2].set(p['fc2_b'])

    wf3 = jnp.zeros((NF2, NCP), f32).at[:nfc2, :num_classes].set(p['fc3_w'].T)
    bf3 = jnp.zeros((1, NCP), f32).at[0, :num_classes].set(p['fc3_b'])

    return dict(w1=w1, b1=b1, w2=w2, b2=b2, wf1=wf1, bf1=bf1, wf2=wf2, bf2=bf2,
                wf3=wf3, bf3=bf3, num_classes=num_classes)


# ----------------------------------------------------------------------------------
# Generation-aware tiling policy.
# ----------------------------------------------------------------------------------
def _vmem_limit_bytes():
    cap = 64 * 1024 * 1024                       # conservative default (v7x physical)
    try:
        info = pltpu.get_tpu_info()
        cap = int(getattr(info, "vmem_capacity_bytes", cap) or cap)
    except Exception:
        pass
    # ~3/4 of physical: <=48 MiB on v7x (64 MiB), up to 96 MiB on v5e/v6e (128 MiB).
    return max(32 * 1024 * 1024, min(cap * 3 // 4, 96 * 1024 * 1024))


def _pick_block_b(B, L, weight_bytes, vmem_limit):
    """Largest batch tile (multiple of 8, <=1024) whose rough VMEM footprint fits,
    accounting for double-buffered I/O tiles, resident (double-buffered) weights and
    the lane-padded conv intermediates; ensures >=2 grid steps for v7x's 2 TCs."""
    L2 = max(L // 2, 1)
    Lp = _round_up(max(L, 1), 8)
    L2p = _round_up(L2, 8)
    per_row = 4 * (2 * Lp * 128          # im2col input tile (lane-padded), double-buffered
                   + 2 * 128             # output tile, double-buffered
                   + 2 * Lp * 128        # conv1 dot output + relu
                   + 2 * L2p * 128       # pooled view + h1p
                   + L2p * 3 * 128       # fused conv2 dot output (3 tap slabs)
                   + 3 * L2p * 128       # shifted slabs + h2
                   + 2 * L2p * 128       # h2p + feat
                   + 4 * 128)            # fc activations + slack
    budget = vmem_limit - 2 * weight_bytes - (4 << 20)
    tb = min(1024, _round_up(B, 8))
    while tb > 8 and tb * per_row > budget:
        tb = _round_up(tb // 2, 8)
    if B >= 16:
        # keep >=2 grid steps so v7x can shard the batch axis across both TensorCores
        tb = min(tb, _round_up(pl.cdiv(B, 2), 8))
    return max(8, tb)


# ----------------------------------------------------------------------------------
# Forward wrapper: host-side im2col, batch grid, resident lane-dense weights.
# ----------------------------------------------------------------------------------
def base_cnn_forward(x, packed, *, block_b=None):
    x = x.astype(jnp.float32)
    B, L = x.shape
    NCP = packed['wf3'].shape[1]
    num_classes = packed['num_classes']

    weights = (packed['w1'], packed['b1'], packed['w2'], packed['b2'],
               packed['wf1'], packed['bf1'], packed['wf2'], packed['bf2'],
               packed['wf3'], packed['bf3'])
    weight_bytes = sum(int(w.size) * 4 for w in weights)
    vmem_limit = _vmem_limit_bytes()

    if block_b is None:
        block_b = _pick_block_b(B, L, weight_bytes, vmem_limit)
    block_b = max(8, _round_up(block_b, 8))
    Bp = _round_up(B, block_b)
    grid = (Bp // block_b,)

    # Host-side im2col for conv1 (k=3, pad=1): shifted views + tap dim padded to 8,
    # so conv1 is a single MXU dot in the kernel (no in-kernel relayout/rotates).
    xpad = jnp.pad(x, ((0, Bp - B), (1, 1)))                        # (Bp, L+2)
    xcol = jnp.stack([xpad[:, 0:L], xpad[:, 1:L + 1], xpad[:, 2:L + 2]], axis=-1)
    xcol = jnp.pad(xcol, ((0, 0), (0, 0), (0, K1P - 3)))            # (Bp, L, 8)

    w_specs = [pl.BlockSpec(w.shape, lambda i: (0, 0)) for w in weights]

    C1P = packed['w1'].shape[1]
    C2P3 = packed['w2'].shape[1]
    NF1 = packed['bf1'].shape[1]
    NF2 = packed['bf2'].shape[1]
    L2, L4 = L // 2, (L // 2) // 2
    flops = 2 * Bp * (L * K1P * C1P                  # conv1 dot
                      + L2 * C1P * C2P3              # conv2 fused dot
                      + (L4 * (C2P3 // 3)) * NF1     # fc1
                      + NF1 * NF2                    # fc2
                      + NF2 * NCP)                   # fc3 (padded)
    bytes_accessed = 4 * (Bp * L * K1P + Bp * NCP) + weight_bytes
    cost = pl.CostEstimate(flops=int(flops),
                           transcendentals=int(Bp * (NF1 + NF2)),
                           bytes_accessed=int(bytes_accessed))

    out = pl.pallas_call(
        base_cnn_kernel,
        out_shape=jax.ShapeDtypeStruct((Bp, NCP), jnp.float32),
        grid=grid,
        in_specs=[pl.BlockSpec((block_b, L, K1P), lambda i: (i, 0, 0))] + w_specs,
        out_specs=pl.BlockSpec((block_b, NCP), lambda i: (i, 0)),
        compiler_params=pltpu.CompilerParams(
            dimension_semantics=("parallel",),
            vmem_limit_bytes=int(vmem_limit)),
        cost_estimate=cost,
    )(xcol, *weights)

    return out[:B, :num_classes]


# ----------------------------------------------------------------------------------
# Pure-JAX replica of the torch forward (NCW) for verification.
# ----------------------------------------------------------------------------------
def reference_forward(x, p):
    B, L = x.shape
    dn = ('NCH', 'OIH', 'NCH')
    y = x.reshape(B, 1, L)
    y = lax.conv_general_dilated(y, p['conv1_w'], (1,), ((1, 1),),
                                 dimension_numbers=dn) + p['conv1_b'][None, :, None]
    y = jnp.maximum(y, 0.0)
    y = y.reshape(B, y.shape[1], y.shape[2] // 2, 2).max(axis=-1)
    y = lax.conv_general_dilated(y, p['conv2_w'], (1,), ((1, 1),),
                                 dimension_numbers=dn) + p['conv2_b'][None, :, None]
    y = jnp.maximum(y, 0.0)
    y = y.reshape(B, y.shape[1], y.shape[2] // 2, 2).max(axis=-1)
    y = y.reshape(B, -1)                       # torch flatten: (C, L) order
    y = _elu(y @ p['fc1_w'].T + p['fc1_b'])
    y = _elu(y @ p['fc2_w'].T + p['fc2_b'])
    return y @ p['fc3_w'].T + p['fc3_b']


if __name__ == "__main__":
    key = jax.random.PRNGKey(0)
    kx, kp, kx2 = jax.random.split(key, 3)

    num_classes, num_columns, window_size = 4, 16, 1
    B = 2
    L = window_size * num_columns

    params = init_params(kp, num_classes, num_columns, window_size)
    packed = pack_params(params)

    x = jax.random.normal(kx, (B, L), jnp.float32)
    out = jax.block_until_ready(base_cnn_forward(x, packed))
    ref = reference_forward(x, params)
    assert out.shape == (B, num_classes)
    assert jnp.allclose(out, ref, atol=1e-3, rtol=1e-3)

    # Multi-tile grid check: B not a multiple of the batch tile (exercises padding path).
    B2 = 20
    x2 = jax.random.normal(kx2, (B2, L), jnp.float32)
    out2 = jax.block_until_ready(base_cnn_forward(x2, packed, block_b=8))
    ref2 = reference_forward(x2, params)
    assert out2.shape == (B2, num_classes)
    assert jnp.allclose(out2, ref2, atol=1e-3, rtol=1e-3)

    print("KERNEL_OK")
</pallas_src>

<mosaic_0001>
module attributes {stable_mosaic.version = 11 : i64} {
  func.func @base_cnn_kernel(%arg0: i32, %arg1: memref<8x16x8xf32, #tpu.memory_space<vmem>>, %arg2: memref<8x128xf32, #tpu.memory_space<vmem>>, %arg3: memref<1x128xf32, #tpu.memory_space<vmem>>, %arg4: memref<128x384xf32, #tpu.memory_space<vmem>>, %arg5: memref<1x128xf32, #tpu.memory_space<vmem>>, %arg6: memref<512x128xf32, #tpu.memory_space<vmem>>, %arg7: memref<1x128xf32, #tpu.memory_space<vmem>>, %arg8: memref<128x128xf32, #tpu.memory_space<vmem>>, %arg9: memref<1x128xf32, #tpu.memory_space<vmem>>, %arg10: memref<128x128xf32, #tpu.memory_space<vmem>>, %arg11: memref<1x128xf32, #tpu.memory_space<vmem>>, %arg12: memref<8x128xf32, #tpu.memory_space<vmem>>) attributes {dimension_semantics = [#tpu.dimension_semantics<parallel>], iteration_bounds = array<i64: 1>, scalar_prefetch = 0 : i64, scratch_operands = 0 : i64, tpu.core_type = #tpu.core_type<tc>, window_params = [{transform_indices = @transform_0, window_bounds = array<i64: 8, 16, 8>}, {pipeline_mode = #tpu.pipeline_mode<synchronous>, transform_indices = @transform_1, window_bounds = array<i64: 8, 128>}, {pipeline_mode = #tpu.pipeline_mode<synchronous>, transform_indices = @transform_2, window_bounds = array<i64: 1, 128>}, {pipeline_mode = #tpu.pipeline_mode<synchronous>, transform_indices = @transform_3, window_bounds = array<i64: 128, 384>}, {pipeline_mode = #tpu.pipeline_mode<synchronous>, transform_indices = @transform_4, window_bounds = array<i64: 1, 128>}, {pipeline_mode = #tpu.pipeline_mode<synchronous>, transform_indices = @transform_5, window_bounds = array<i64: 512, 128>}, {pipeline_mode = #tpu.pipeline_mode<synchronous>, transform_indices = @transform_6, window_bounds = array<i64: 1, 128>}, {pipeline_mode = #tpu.pipeline_mode<synchronous>, transform_indices = @transform_7, window_bounds = array<i64: 128, 128>}, {pipeline_mode = #tpu.pipeline_mode<synchronous>, transform_indices = @transform_8, window_bounds = array<i64: 1, 128>}, {pipeline_mode = #tpu.pipeline_mode<synchronous>, transform_indices = @transform_9, window_bounds = array<i64: 128, 128>}, {pipeline_mode = #tpu.pipeline_mode<synchronous>, transform_indices = @transform_10, window_bounds = array<i64: 1, 128>}, {transform_indices = @transform_11, window_bounds = array<i64: 8, 128>}]} {
    %c0 = arith.constant 0 : index
    %c0_0 = arith.constant 0 : index
    %c0_1 = arith.constant 0 : index
    %0 = vector.load %arg1[%c0, %c0_0, %c0_1] : memref<8x16x8xf32, #tpu.memory_space<vmem>>, vector<8x16x8xf32>
    %1 = vector.shape_cast %0 : vector<8x16x8xf32> to vector<128x8xf32>
    %c0_2 = arith.constant 0 : index
    %c0_3 = arith.constant 0 : index
    %2 = vector.load %arg2[%c0_2, %c0_3] : memref<8x128xf32, #tpu.memory_space<vmem>>, vector<8x128xf32>
    %cst = arith.constant dense<0.000000e+00> : vector<128x128xf32>
    %3 = tpu.matmul %1, %2, %cst {dimension_numbers = #tpu.dot_dimension_numbers<[1], [0], [0], [1], [0, 0, 1, 1], [], []>} : vector<128x8xf32>, vector<8x128xf32>, vector<128x128xf32> -> vector<128x128xf32>
    %c0_4 = arith.constant 0 : index
    %c0_5 = arith.constant 0 : index
    %4 = vector.load %arg3[%c0_4, %c0_5] : memref<1x128xf32, #tpu.memory_space<vmem>>, vector<1x128xf32>
    %5 = vector.broadcast %4 : vector<1x128xf32> to vector<128x128xf32>
    %6 = arith.addf %3, %5 : vector<128x128xf32>
    %cst_6 = arith.constant 0.000000e+00 : f32
    %7 = vector.broadcast %cst_6 : f32 to vector<128x128xf32>
    %8 = arith.maximumf %6, %7 : vector<128x128xf32>
    %9 = vector.shape_cast %8 : vector<128x128xf32> to vector<8x16x128xf32>
    %10 = vector.shape_cast %9 : vector<8x16x128xf32> to vector<8x8x256xf32>
    %11 = vector.extract_strided_slice %10 {offsets = [0, 0, 0], sizes = [8, 8, 128], strides = [1, 1, 1]} : vector<8x8x256xf32> to vector<8x8x128xf32>
    %12 = vector.extract_strided_slice %10 {offsets = [0, 0, 128], sizes = [8, 8, 128], strides = [1, 1, 1]} : vector<8x8x256xf32> to vector<8x8x128xf32>
    %13 = arith.maximumf %11, %12 : vector<8x8x128xf32>
    %14 = vector.shape_cast %13 : vector<8x8x128xf32> to vector<64x128xf32>
    %c0_7 = arith.constant 0 : index
    %c0_8 = arith.constant 0 : index
    %15 = vector.load %arg4[%c0_7, %c0_8] : memref<128x384xf32, #tpu.memory_space<vmem>>, vector<128x384xf32>
    %cst_9 = arith.constant dense<0.000000e+00> : vector<64x384xf32>
    %16 = tpu.matmul %14, %15, %cst_9 {dimension_numbers = #tpu.dot_dimension_numbers<[1], [0], [0], [1], [0, 0, 1, 1], [], []>} : vector<64x128xf32>, vector<128x384xf32>, vector<64x384xf32> -> vector<64x384xf32>
    %17 = vector.shape_cast %16 : vector<64x384xf32> to vector<8x8x384xf32>
    %18 = vector.extract_strided_slice %17 {offsets = [0, 0, 128], sizes = [8, 8, 128], strides = [1, 1, 1]} : vector<8x8x384xf32> to vector<8x8x128xf32>
    %cst_10 = arith.constant 0.000000e+00 : f32
    %19 = vector.broadcast %cst_10 : f32 to vector<8x1x128xf32>
    %20 = vector.extract_strided_slice %17 {offsets = [0, 0, 0], sizes = [8, 7, 128], strides = [1, 1, 1]} : vector<8x8x384xf32> to vector<8x7x128xf32>
    %21 = tpu.concatenate %19, %20 in 1 : vector<8x1x128xf32>, vector<8x7x128xf32> -> vector<8x8x128xf32>
    %22 = vector.extract_strided_slice %17 {offsets = [0, 1, 256], sizes = [8, 7, 128], strides = [1, 1, 1]} : vector<8x8x384xf32> to vector<8x7x128xf32>
    %23 = tpu.concatenate %22, %19 in 1 : vector<8x7x128xf32>, vector<8x1x128xf32> -> vector<8x8x128xf32>
    %24 = arith.addf %21, %18 : vector<8x8x128xf32>
    %25 = arith.addf %24, %23 : vector<8x8x128xf32>
    %c0_11 = arith.constant 0 : index
    %c0_12 = arith.constant 0 : index
    %26 = vector.load %arg5[%c0_11, %c0_12] : memref<1x128xf32, #tpu.memory_space<vmem>>, vector<1x128xf32>
    %27 = vector.shape_cast %26 : vector<1x128xf32> to vector<1x1x128xf32>
    %28 = vector.broadcast %27 : vector<1x1x128xf32> to vector<8x8x128xf32>
    %29 = arith.addf %25, %28 : vector<8x8x128xf32>
    %cst_13 = arith.constant 0.000000e+00 : f32
    %30 = vector.broadcast %cst_13 : f32 to vector<8x8x128xf32>
    %31 = arith.maximumf %29, %30 : vector<8x8x128xf32>
    %32 = vector.shape_cast %31 : vector<8x8x128xf32> to vector<8x4x256xf32>
    %33 = vector.extract_strided_slice %32 {offsets = [0, 0, 0], sizes = [8, 4, 128], strides = [1, 1, 1]} : vector<8x4x256xf32> to vector<8x4x128xf32>
    %34 = vector.extract_strided_slice %32 {offsets = [0, 0, 128], sizes = [8, 4, 128], strides = [1, 1, 1]} : vector<8x4x256xf32> to vector<8x4x128xf32>
    %35 = arith.maximumf %33, %34 : vector<8x4x128xf32>
    %36 = vector.shape_cast %35 : vector<8x4x128xf32> to vector<8x512xf32>
    %c0_14 = arith.constant 0 : index
    %c0_15 = arith.constant 0 : index
    %37 = vector.load %arg6[%c0_14, %c0_15] : memref<512x128xf32, #tpu.memory_space<vmem>>, vector<512x128xf32>
    %cst_16 = arith.constant dense<0.000000e+00> : vector<8x128xf32>
    %38 = tpu.matmul %36, %37, %cst_16 {dimension_numbers = #tpu.dot_dimension_numbers<[1], [0], [0], [1], [0, 0, 1, 1], [], []>} : vector<8x512xf32>, vector<512x128xf32>, vector<8x128xf32> -> vector<8x128xf32>
    %c0_17 = arith.constant 0 : index
    %c0_18 = arith.constant 0 : index
    %39 = vector.load %arg7[%c0_17, %c0_18] : memref<1x128xf32, #tpu.memory_space<vmem>>, vector<1x128xf32>
    %40 = vector.broadcast %39 : vector<1x128xf32> to vector<8x128xf32>
    %41 = arith.addf %38, %40 : vector<8x128xf32>
    %cst_19 = arith.constant 0.000000e+00 : f32
    %42 = vector.broadcast %cst_19 : f32 to vector<8x128xf32>
    %43 = arith.cmpf ogt, %41, %42 : vector<8x128xf32>
    %cst_20 = arith.constant 0.000000e+00 : f32
    %44 = vector.broadcast %cst_20 : f32 to vector<8x128xf32>
    %45 = arith.minimumf %41, %44 : vector<8x128xf32>
    %46 = math.exp %45 : vector<8x128xf32>
    %cst_21 = arith.constant 1.000000e+00 : f32
    %47 = vector.broadcast %cst_21 : f32 to vector<8x128xf32>
    %48 = arith.subf %46, %47 : vector<8x128xf32>
    %49 = arith.select %43, %41, %48 : vector<8x128xi1>, vector<8x128xf32>
    %c0_22 = arith.constant 0 : index
    %c0_23 = arith.constant 0 : index
    %50 = vector.load %arg8[%c0_22, %c0_23] : memref<128x128xf32, #tpu.memory_space<vmem>>, vector<128x128xf32>
    %cst_24 = arith.constant dense<0.000000e+00> : vector<8x128xf32>
    %51 = tpu.matmul %49, %50, %cst_24 {dimension_numbers = #tpu.dot_dimension_numbers<[1], [0], [0], [1], [0, 0, 1, 1], [], []>} : vector<8x128xf32>, vector<128x128xf32>, vector<8x128xf32> -> vector<8x128xf32>
    %c0_25 = arith.constant 0 : index
    %c0_26 = arith.constant 0 : index
    %52 = vector.load %arg9[%c0_25, %c0_26] : memref<1x128xf32, #tpu.memory_space<vmem>>, vector<1x128xf32>
    %53 = vector.broadcast %52 : vector<1x128xf32> to vector<8x128xf32>
    %54 = arith.addf %51, %53 : vector<8x128xf32>
    %cst_27 = arith.constant 0.000000e+00 : f32
    %55 = vector.broadcast %cst_27 : f32 to vector<8x128xf32>
    %56 = arith.cmpf ogt, %54, %55 : vector<8x128xf32>
    %cst_28 = arith.constant 0.000000e+00 : f32
    %57 = vector.broadcast %cst_28 : f32 to vector<8x128xf32>
    %58 = arith.minimumf %54, %57 : vector<8x128xf32>
    %59 = math.exp %58 : vector<8x128xf32>
    %cst_29 = arith.constant 1.000000e+00 : f32
    %60 = vector.broadcast %cst_29 : f32 to vector<8x128xf32>
    %61 = arith.subf %59, %60 : vector<8x128xf32>
    %62 = arith.select %56, %54, %61 : vector<8x128xi1>, vector<8x128xf32>
    %c0_30 = arith.constant 0 : index
    %c0_31 = arith.constant 0 : index
    %63 = vector.load %arg10[%c0_30, %c0_31] : memref<128x128xf32, #tpu.memory_space<vmem>>, vector<128x128xf32>
    %cst_32 = arith.constant dense<0.000000e+00> : vector<8x128xf32>
    %64 = tpu.matmul %62, %63, %cst_32 {dimension_numbers = #tpu.dot_dimension_numbers<[1], [0], [0], [1], [0, 0, 1, 1], [], []>} : vector<8x128xf32>, vector<128x128xf32>, vector<8x128xf32> -> vector<8x128xf32>
    %c0_33 = arith.constant 0 : index
    %c0_34 = arith.constant 0 : index
    %65 = vector.load %arg11[%c0_33, %c0_34] : memref<1x128xf32, #tpu.memory_space<vmem>>, vector<1x128xf32>
    %66 = vector.broadcast %65 : vector<1x128xf32> to vector<8x128xf32>
    %67 = arith.addf %64, %66 : vector<8x128xf32>
    %c0_35 = arith.constant 0 : index
    %c0_36 = arith.constant 0 : index
    %68 = vector.load %arg12[%c0_35, %c0_36] : memref<8x128xf32, #tpu.memory_space<vmem>>, vector<8x128xf32>
    tpu.vector_store %arg12[%c0_35, %c0_36], %67 {strides = array<i32>} : memref<8x128xf32, #tpu.memory_space<vmem>>, vector<8x128xf32>,
    return
  }
  func.func @transform_0(%arg0: i32) -> (i32, i32, i32) {
    %c0_i32 = arith.constant 0 : i32
    %c0_i32_0 = arith.constant 0 : i32
    %c0_i32_1 = arith.constant 0 : i32
    return %arg0, %c0_i32, %c0_i32_0 : i32, i32, i32
  }
  func.func @transform_1(%arg0: i32) -> (i32, i32) {
    %c0_i32 = arith.constant 0 : i32
    %c0_i32_0 = arith.constant 0 : i32
    %c0_i32_1 = arith.constant 0 : i32
    return %c0_i32, %c0_i32_0 : i32, i32
  }
  func.func @transform_2(%arg0: i32) -> (i32, i32) {
    %c0_i32 = arith.constant 0 : i32
    %c0_i32_0 = arith.constant 0 : i32
    %c0_i32_1 = arith.constant 0 : i32
    return %c0_i32, %c0_i32_0 : i32, i32
  }
  func.func @transform_3(%arg0: i32) -> (i32, i32) {
    %c0_i32 = arith.constant 0 : i32
    %c0_i32_0 = arith.constant 0 : i32
    %c0_i32_1 = arith.constant 0 : i32
    return %c0_i32, %c0_i32_0 : i32, i32
  }
  func.func @transform_4(%arg0: i32) -> (i32, i32) {
    %c0_i32 = arith.constant 0 : i32
    %c0_i32_0 = arith.constant 0 : i32
    %c0_i32_1 = arith.constant 0 : i32
    return %c0_i32, %c0_i32_0 : i32, i32
  }
  func.func @transform_5(%arg0: i32) -> (i32, i32) {
    %c0_i32 = arith.constant 0 : i32
    %c0_i32_0 = arith.constant 0 : i32
    %c0_i32_1 = arith.constant 0 : i32
    return %c0_i32, %c0_i32_0 : i32, i32
  }
  func.func @transform_6(%arg0: i32) -> (i32, i32) {
    %c0_i32 = arith.constant 0 : i32
    %c0_i32_0 = arith.constant 0 : i32
    %c0_i32_1 = arith.constant 0 : i32
    return %c0_i32, %c0_i32_0 : i32, i32
  }
  func.func @transform_7(%arg0: i32) -> (i32, i32) {
    %c0_i32 = arith.constant 0 : i32
    %c0_i32_0 = arith.constant 0 : i32
    %c0_i32_1 = arith.constant 0 : i32
    return %c0_i32, %c0_i32_0 : i32, i32
  }
  func.func @transform_8(%arg0: i32) -> (i32, i32) {
    %c0_i32 = arith.constant 0 : i32
    %c0_i32_0 = arith.constant 0 : i32
    %c0_i32_1 = arith.constant 0 : i32
    return %c0_i32, %c0_i32_0 : i32, i32
  }
  func.func @transform_9(%arg0: i32) -> (i32, i32) {
    %c0_i32 = arith.constant 0 : i32
    %c0_i32_0 = arith.constant 0 : i32
    %c0_i32_1 = arith.constant 0 : i32
    return %c0_i32, %c0_i32_0 : i32, i32
  }
  func.func @transform_10(%arg0: i32) -> (i32, i32) {
    %c0_i32 = arith.constant 0 : i32
    %c0_i32_0 = arith.constant 0 : i32
    %c0_i32_1 = arith.constant 0 : i32
    return %c0_i32, %c0_i32_0 : i32, i32
  }
  func.func @transform_11(%arg0: i32) -> (i32, i32) {
    %c0_i32 = arith.constant 0 : i32
    %c0_i32_0 = arith.constant 0 : i32
    return %arg0, %c0_i32 : i32, i32
  }
}

</mosaic_0001>

<bundles_post_ra>
// kernel: tpu_custom_call.1
= control target key start
LH: loop header
LB: loop body
LE: loop exit
PB: predicated region body
PF: predicated region fallthrough
CT: control target
= control target key end

     0   :  { %16 = vsyncpa [#allocation3], 0  ;;  %s2448_s0 = inlined_call_operand.vmem [shape: f32[8,16,8], index: 0, kind: input, shape index: {}]   ;;  %s2449_s1 = inlined_call_operand.vmem [shape: f32[8,128], index: 1, kind: input, shape index: {}]   ;;  %s2450_s2 = inlined_call_operand.vmem [shape: f32[1,128], index: 2, kind: input, shape index: {}]   ;;  %s2451_s3 = inlined_call_operand.hbm [shape: f32[128,384], index: 3, kind: input, shape index: {}]   ;;  %s2452_s4 = inlined_call_operand.vmem [shape: f32[1,128], index: 4, kind: input, shape index: {}]   ;;  %s2453_s5 = inlined_call_operand.hbm [shape: f32[512,128], index: 5, kind: input, shape index: {}]   ;;  %s2454_s6 = inlined_call_operand.vmem [shape: f32[1,128], index: 6, kind: input, shape index: {}]   ;;  %s2455_s7 = inlined_call_operand.vmem [shape: f32[128,128], index: 7, kind: input, shape index: {}]   ;;  %s2456_s8 = inlined_call_operand.vmem [shape: f32[1,128], index: 8, kind: input, shape index: {}]   ;;  %s2457_s9 = inlined_call_operand.hbm [shape: f32[128,128], index: 9, kind: input, shape index: {}]   ;;  %s2458_s10 = inlined_call_operand.vmem [shape: f32[1,128], index: 10, kind: input, shape index: {}]   ;;  %s2459_s11 = inlined_call_operand.hbm [shape: f32[8,128], index: 11, kind: output, shape index: {}]  }
   0x1   :  { %17 = vsyncpa [#allocation6], 0 }
   0x2   :  { %18 = vsyncpa [#allocation4], 0  ;;  %s2089_s17 = smov [#allocation5]   ;;  %s1995_s21 = scalar_lea.hbm %s2453_s5, 8192 }
   0x3   :  { %s44_s18 = sshll.u32 %s2089_s17, 4  ;;  %p1996_p0 = scmp.ne.s32.totalorder %s2453_s5, %s1995_s21  ;;  %s45_s18 = int_to_ptr.vmem [resolvable:$true] %s44_s18 }
   0x4   :  { %p1999_p1 = scmp.lt.u32.totalorder %s1995_s21, %s2453_s5 }
   0x6   :  { %p2001_p2 = pnand %p1999_p1, %p1996_p0 }
   0x8   :  { %2004 = shalt.err (!%p2001_p2)
}
   0x9   :  { %s2005_s26 = scalar_lea.vmem %s45_s18, 8192  ;;  %p2010_p4 = scmp.lt.s32.totalorder %s45_s18, %s45_s18 }
   0xa   :  { %p2006_p3 = scmp.ne.s32.totalorder %s45_s18, %s2005_s26  ;;  %p2011_p5 = scmp.lt.s32.totalorder %s2005_s26, %s2005_s26 }
   0xc   :  { %p2012_p6 = por %p2011_p5, %p2010_p4 }
   0xe   :  { %p2013_p7 = pnand %p2012_p6, %p2006_p3 }
  0x10   :  { %2016 = shalt.err (!%p2013_p7)
}
  0x11   :  { %s2090_s27 = smov 128   ;;  %s2091_s28 = smov 8  }
  0x12   :  { %50 = dma.hbm_to_vmem [thread:$0]  %s2453_s5, 8192, %s45_s18, [#allocation6], %s2090_s27, %s2090_s27, %s2091_s28  }
  0x13   :  { %s2092_s12 = smov [#allocation2]   ;;  %s2017_s16 = scalar_lea.hbm %s2451_s3, 6144 }
  0x14   :  { %s30_s13 = sshll.u32 %s2092_s12, 4  ;;  %p2018_p8 = scmp.ne.s32.totalorder %s2451_s3, %s2017_s16  ;;  %s31_s13 = int_to_ptr.vmem [resolvable:$true] %s30_s13 }
  0x15   :  { %p2021_p9 = scmp.lt.u32.totalorder %s2017_s16, %s2451_s3 }
  0x17   :  { %p2023_p10 = pnand %p2021_p9, %p2018_p8 }
  0x19   :  { %2026 = shalt.err (!%p2023_p10)
}
  0x1a   :  { %s2027_s22 = scalar_lea.vmem %s31_s13, 6144  ;;  %p2032_p12 = scmp.lt.s32.totalorder %s31_s13, %s31_s13 }
  0x1b   :  { %p2028_p11 = scmp.ne.s32.totalorder %s31_s13, %s2027_s22  ;;  %p2033_p13 = scmp.lt.s32.totalorder %s2027_s22, %s2027_s22 }
  0x1d   :  { %p2034_p0 = por %p2033_p13, %p2032_p12 }
  0x1f   :  { %p2035_p1 = pnand %p2034_p0, %p2028_p11 }
  0x21   :  { %2038 = shalt.err (!%p2035_p1)
}
  0x22   :  { %s2093_s5 = smov 384   ;;  %s2094_s18 = smov 24  }
  0x23   :  { %36 = dma.hbm_to_vmem [thread:$0]  %s2451_s3, 6144, %s31_s13, [#allocation3], %s2093_s5, %s2093_s5, %s2094_s18  }
  0x24   :  { %s2095_s25 = smov [#allocation7]   ;;  %s2039_s12 = scalar_lea.hbm %s2457_s9, 2048 }
  0x25   :  { %s62_s26 = sshll.u32 %s2095_s25, 4  ;;  %p2040_p2 = scmp.ne.s32.totalorder %s2457_s9, %s2039_s12  ;;  %s63_s26 = int_to_ptr.vmem [resolvable:$true] %s62_s26 }
  0x26   :  { %p2043_p3 = scmp.lt.u32.totalorder %s2039_s12, %s2457_s9 }
  0x28   :  { %p2045_p4 = pnand %p2043_p3, %p2040_p2 }
  0x2a   :  { %2048 = shalt.err (!%p2045_p4)
}
  0x2b   :  { %s2049_s19 = scalar_lea.vmem %s63_s26, 2048  ;;  %p2054_p6 = scmp.lt.s32.totalorder %s63_s26, %s63_s26 }
  0x2c   :  { %p2050_p5 = scmp.ne.s32.totalorder %s63_s26, %s2049_s19  ;;  %p2055_p7 = scmp.lt.s32.totalorder %s2049_s19, %s2049_s19 }
  0x2e   :  { %p2056_p8 = por %p2055_p7, %p2054_p6 }
  0x30   :  { %p2057_p9 = pnand %p2056_p8, %p2050_p5 }
  0x32   :  { %2060 = shalt.err (!%p2057_p9)
}
  0x33   :  { %68 = dma.hbm_to_vmem [thread:$0]  %s2457_s9, 2048, %s63_s26, [#allocation6], %s2090_s27, %s2090_s27, %s2091_s28  }
  0x34   :  { %2083 = dma.done.wait [#allocation3], 6144  }
  0x35   :  { %2084 = vsyncadd [#allocation3], 4294961152 }
  0x36   :  { %2085 = dma.done.wait [#allocation6], 10240  }
  0x37   :  { %2086 = vsyncadd [#allocation6], 4294957056  ;;  %vm104_vm0 = vcmask 64512   ;;  %v96_v0 = vld [vmem:[%s2449_s1] sm:$0xff]  ;;  %v81_v2 = vld [vmem:[%s2448_s0 + $0x8] sm:$0xff]  ;;  %vm812_vm1 = vcmask 1040384  }
  0x38   :  { %v80_v1 = vld [vmem:[%s2448_s0] sm:$0xff]  ;;  %1661 = vmatprep.subr.mxu0 %v96_v0  ;;  %v82_v3 = vld [vmem:[%s2448_s0 + $0x10] sm:$0xff]  ;;  %v83_v4 = vld [vmem:[%s2448_s0 + $0x18] sm:$0xff]  ;;  %vm845_vm2 = vcmask 1046528   ;;  %vm2101_vm3 = vmmov 0   ;;  %s2102_s13 = smov [#allocation8]  }
  0x39   :  { %1663 = vmatprep.mubr.msk.f32.mxu0 %vm104_vm0, %v80_v1  ;;  %1662 = vmatpush3.msra.mxu0 %v96_v0  ;;  %v84_v5 = vld [vmem:[%s2448_s0 + $0x20] sm:$0xff]  ;;  %v491_v6 = vld [vmem:[#allocation2 + $0x8] sm:$0xff]  ;;  %v493_v10 = vld [vmem:[#allocation2 + $0x18] sm:$0xff]  ;;  %s1481_s20 = sshll.u32 %s2102_s13, 4  ;;  %s1482_s20 = int_to_ptr.vmem [resolvable:$true] %s1481_s20 }
  0x3a   :  { %1664 = vmatmul.mubr.msk.f32.vlgmr.msra.gmra.mrb[0].mxu0 %vm104_vm0, %v81_v2  ;;  %v85_v7 = vld [vmem:[%s2448_s0 + $0x28] sm:$0xff]  ;;  %v494_v8 = vld [vmem:[#allocation2 + $0x20] sm:$0xff]  ;;  %v86_v11 = vld [vmem:[%s2448_s0 + $0x30] sm:$0xff]  ;;  %p2066_p11 = scmp.lt.s32.totalorder %s1482_s20, %s1482_s20 }
  0x3b   :  { %1666 = vmatprep.mubr.msk.f32.mxu0 %vm104_vm0, %v82_v3  ;;  %v490_v9 = vld [vmem:[#allocation2] sm:$0xff]  ;;  %v1801_v12 = vpack.c.bf16 %v494_v8, %v491_v6  ;;  %v497_v14 = vld [vmem:[#allocation2 + $0x38] sm:$0xff]  ;;  %v500_v15 = vld [vmem:[#allocation2 + $0x50] sm:$0xff] }
  0x3c   :  { %v1803_v13 = vpack.c.bf16 %v493_v10, %v490_v9  ;;  %v492_v16 = vld [vmem:[#allocation2 + $0x10] sm:$0xff]  ;;  %v1805_v17 = vpack.c.bf16 %v500_v15, %v497_v14  ;;  %v495_v18 = vld [vmem:[#allocation2 + $0x28] sm:$0xff]  ;;  %v506_v23 = vld [vmem:[#allocation2 + $0x80] sm:$0xff] }
  0x3d   :  { %v496_v19 = vld [vmem:[#allocation2 + $0x30] sm:$0xff]  ;;  %v499_v20 = vld [vmem:[#allocation2 + $0x48] sm:$0xff]  ;;  %1802 = vmatprep.subr.bf16.mxu1 %v1801_v12  ;;  %v1833_v21 = vpack.c.bf16 %v495_v18, %v492_v16  ;;  %v498_v24 = vld [vmem:[#allocation2 + $0x40] sm:$0xff] }
  0x3e   :  { %1667 = vmatmul.mubr.msk.f32.gmra.mrb[2].mxu0 %vm104_vm0, %v83_v4  ;;  %v503_v22 = vld [vmem:[#allocation2 + $0x68] sm:$0xff]  ;;  %v87_v25 = vld [vmem:[%s2448_s0 + $0x38] sm:$0xff]  ;;  %1804 = vmatpush1.bf16.msra.mxu1 %v1803_v13  ;;  %v1807_v26 = vpack.c.bf16 %v499_v20, %v496_v19  ;;  %v502_v30 = vld [vmem:[#allocation2 + $0x60] sm:$0xff] }
  0x3f   :  { %1669 = vmatprep.mubr.msk.f32.mxu0 %vm104_vm0, %v84_v5  ;;  %v501_v27 = vld [vmem:[#allocation2 + $0x58] sm:$0xff]  ;;  %1806 = vmatprep.subr.bf16.mxu1 %v1805_v17  ;;  %v1809_v28 = vpack.c.bf16 %v506_v23, %v503_v22  ;;  %v504_v32 = vld [vmem:[#allocation2 + $0x70] sm:$0xff]  ;;  %v507_v35 = vld [vmem:[#allocation2 + $0x88] sm:$0xff] }
  0x40   :  { %v1837_v29 = vpack.c.bf16 %v501_v27, %v498_v24  ;;  %v505_v31 = vld [vmem:[#allocation2 + $0x78] sm:$0xff]  ;;  %1834 = vmatprep.subr.bf16.mxu0 %v1833_v21  ;;  %v512_v34 = vld [vmem:[#allocation2 + $0xb0] sm:$0xff]  ;;  %v88_v36 = vld [vmem:[%s2448_s0 + $0x40] sm:$0xff]  ;;  %v1841_v38 = vpack.c.bf16 %v507_v35, %v504_v32 }
  0x41   :  { %v509_v33 = vld [vmem:[#allocation2 + $0x98] sm:$0xff]  ;;  %1836 = vmatpush3.bf16.msra.mxu0 %v1833_v21  ;;  %v1811_v37 = vpack.c.bf16 %v505_v31, %v502_v30  ;;  %v508_v39 = vld [vmem:[#allocation2 + $0x90] sm:$0xff]  ;;  %v511_v41 = vld [vmem:[#allocation2 + $0xa8] sm:$0xff] }
  0x42   :  { %1670 = vmatmul.mubr.msk.f32.gmra.mrb[4].mxu0 %vm104_vm0, %v85_v7  ;;  %1808 = vmatpush1.bf16.msra.mxu1 %v1807_v26  ;;  %v1813_v40 = vpack.c.bf16 %v512_v34, %v509_v33  ;;  %v510_v42 = vld [vmem:[#allocation2 + $0xa0] sm:$0xff]  ;;  %v513_v43 = vld [vmem:[#allocation2 + $0xb8] sm:$0xff]  ;;  %v89_v44 = vld [vmem:[%s2448_s0 + $0x48] sm:$0xff]  ;;  %v1815_v48 = vpack.c.bf16 %v511_v41, %v508_v39  ;;  %v2097_v26 = vmov 1966171168  }
  0x43   :  { %1672 = vmatprep.mubr.msk.f32.mxu0 %vm104_vm0, %v86_v11  ;;  %1838 = vmatprep.subr.bf16.mxu0 %v1837_v29  ;;  %v515_v45 = vld [vmem:[#allocation2 + $0xc8] sm:$0xff]  ;;  %v518_v46 = vld [vmem:[#allocation2 + $0xe0] sm:$0xff]  ;;  %v90_v47 = vld [vmem:[%s2448_s0 + $0x50] sm:$0xff]  ;;  %v1845_v49 = vpack.c.bf16 %v513_v43, %v510_v42  ;;  %v315_v27 = vunpack.c.l.s4 %v2097_v26 }
  0x44   :  { %1810 = vmatprep.subr.bf16.mxu1 %v1809_v28  ;;  %v1817_v50 = vpack.c.bf16 %v518_v46, %v515_v45  ;;  %v514_v51 = vld [vmem:[#allocation2 + $0xc0] sm:$0xff]  ;;  %v517_v52 = vld [vmem:[#allocation2 + $0xd8] sm:$0xff]  ;;  %v93_v56 = vld [vmem:[%s2448_s0 + $0x68] sm:$0xff]  ;;  %v317_v28 = vlaneseq }
  0x45   :  { %1840 = vmatpush3.bf16.msra.mxu0 %v1837_v29  ;;  %v91_v53 = vld [vmem:[%s2448_s0 + $0x58] sm:$0xff]  ;;  %v92_v54 = vld [vmem:[%s2448_s0 + $0x60] sm:$0xff]  ;;  %v1819_v55 = vpack.c.bf16 %v517_v52, %v514_v51  ;;  %v94_v57 = vld [vmem:[%s2448_s0 + $0x70] sm:$0xff]  ;;  %v316_v29 = vunpack.c.0.s8 %v315_v27 }
  0x46   :  { %1673 = vmatmul.mubr.msk.f32.gmra.mrb[6].mxu0 %vm104_vm0, %v87_v25  ;;  %1812 = vmatpush1.bf16.msra.mxu1 %v1811_v37  ;;  %v95_v58 = vld [vmem:[%s2448_s0 + $0x78] sm:$0xff]  ;;  %v524_v60 = vld [vmem:[#allocation2 + $0x110] sm:$0xff]  ;;  %v519_v63 = vld [vmem:[#allocation2 + $0xe8] sm:$0xff]  ;;  %v2096_v25 = vmov 0.0   ;;  %v2273_v30 = vshrl.u32 %v317_v28, 7 }
  0x47   :  { %1675 = vmatprep.mubr.msk.f32.mxu0 %vm104_vm0, %v88_v36  ;;  %1842 = vmatprep.subr.bf16.mxu0 %v1841_v38  ;;  %v521_v59 = vld [vmem:[#allocation2 + $0xf8] sm:$0xff]  ;;  %v516_v61 = vld [vmem:[#allocation2 + $0xd0] sm:$0xff]  ;;  %v523_v2 = vld [vmem:[#allocation2 + $0x108] sm:$0xff] }
  0x48   :  { %1814 = vmatprep.subr.bf16.mxu1 %v1813_v40  ;;  %v1821_v62 = vpack.c.bf16 %v524_v60, %v521_v59  ;;  %v520_v0 = vld [vmem:[#allocation2 + $0xf0] sm:$0xff]  ;;  %v1849_v1 = vpack.c.bf16 %v519_v63, %v516_v61  ;;  %v527_v4 = vld [vmem:[#allocation2 + $0x128] sm:$0xff]  ;;  %v530_v5 = vld [vmem:[#allocation2 + $0x140] sm:$0xff]  ;;  %634 = vmatprep.mubr.f32.mxu1 %v2096_v25  ;;  %v2282_v34 = vsub.s32 %v316_v29, %v2273_v30 }
  0x49   :  { %1844 = vmatpush3.bf16.msra.mxu0 %v1841_v38  ;;  %v1823_v3 = vpack.c.bf16 %v523_v2, %v520_v0  ;;  %v522_v6 = vld [vmem:[#allocation2 + $0x100] sm:$0xff]  ;;  %v1825_v7 = vpack.c.bf16 %v530_v5, %v527_v4  ;;  %v525_v8 = vld [vmem:[#allocation2 + $0x118] sm:$0xff]  ;;  %v536_v14 = vld [vmem:[#allocation2 + $0x170] sm:$0xff] }
  0x4a   :  { %1676 = vmatmul.mubr.msk.f32.gmra.mrb[8].mxu0 %vm104_vm0, %v89_v44  ;;  %1816 = vmatpush1.bf16.msra.mxu1 %v1815_v48  ;;  %v526_v9 = vld [vmem:[#allocation2 + $0x120] sm:$0xff]  ;;  %v529_v10 = vld [vmem:[#allocation2 + $0x138] sm:$0xff]  ;;  %v1853_v11 = vpack.c.bf16 %v525_v8, %v522_v6  ;;  %v528_v15 = vld [vmem:[#allocation2 + $0x130] sm:$0xff] }
  0x4b   :  { %1678 = vmatprep.mubr.msk.f32.mxu0 %vm104_vm0, %v90_v47  ;;  %1846 = vmatprep.subr.bf16.mxu0 %v1845_v49  ;;  %v1827_v12 = vpack.c.bf16 %v529_v10, %v526_v9  ;;  %v533_v13 = vld [vmem:[#allocation2 + $0x158] sm:$0xff]  ;;  %v531_v17 = vld [vmem:[#allocation2 + $0x148] sm:$0xff]  ;;  %v532_v18 = vld [vmem:[#allocation2 + $0x150] sm:$0xff] }
  0x4c   :  { %1818 = vmatprep.subr.bf16.mxu1 %v1817_v50  ;;  %v1829_v16 = vpack.c.bf16 %v536_v14, %v533_v13  ;;  %v535_v19 = vld [vmem:[#allocation2 + $0x168] sm:$0xff]  ;;  %v1857_v20 = vpack.c.bf16 %v531_v17, %v528_v15  ;;  %v534_v22 = vld [vmem:[#allocation2 + $0x160] sm:$0xff]  ;;  %v537_v23 = vld [vmem:[#allocation2 + $0x178] sm:$0xff] }
  0x4d   :  { %1848 = vmatpush3.bf16.msra.mxu0 %v1845_v49  ;;  %v1831_v21 = vpack.c.bf16 %v535_v19, %v532_v18  ;;  %v1861_v24 = vpack.c.bf16 %v537_v23, %v534_v22  ;;  %v2278_v31 = vld [vmem:[%s2450_s2] ss:$0 sm:$0xff] }
  0x4e   :  { %1679 = vmatmul.mubr.msk.f32.gmra.mrb[10].mxu0 %vm104_vm0, %v91_v53  ;;  %1820 = vmatpush1.bf16.msra.mxu1 %v1819_v55 }
  0x4f   :  { %1681 = vmatprep.mubr.msk.f32.mxu0 %vm104_vm0, %v92_v54  ;;  %1822 = vmatprep.subr.bf16.mxu1 %v1821_v62 }
  0x50   :  { %1850 = vmatprep.subr.bf16.mxu0 %v1849_v1 }
  0x51   :  { %1852 = vmatpush3.bf16.msra.mxu0 %v1849_v1 }
  0x52   :  { %1682 = vmatmul.mubr.msk.f32.gmra.mrb[12].mxu0 %vm104_vm0, %v93_v56  ;;  %1824 = vmatpush1.bf16.msra.mxu1 %v1823_v3 }
  0x53   :  { %1684 = vmatprep.mubr.msk.f32.mxu0 %vm104_vm0, %v94_v57  ;;  %1826 = vmatprep.subr.bf16.mxu1 %v1825_v7 }
  0x54   :  { %1854 = vmatprep.subr.bf16.mxu0 %v1853_v11 }
  0x55   :  { %1856 = vmatpush3.bf16.msra.mxu0 %v1853_v11 }
  0x56   :  { %1685 = vmatmul.mubr.msk.f32.gmra.mrb[14].mxu0 %vm104_vm0, %v95_v58  ;;  %1828 = vmatpush1.bf16.msra.mxu1 %v1827_v12 }
  0x57   :  { %1830 = vmatprep.subr.bf16.mxu1 %v1829_v16  ;;  %1858 = vmatprep.subr.bf16.mxu0 %v1857_v20 }
  0x59   :  { %1860 = vmatpush3.bf16.msra.mxu0 %v1857_v20 }
  0x5a   :  { %1832 = vmatpush1.bf16.msra.mxu1 %v1831_v21  ;;  %1862 = vmatprep.subr.bf16.mxu0 %v1861_v24 }
  0x5d   :  { %1864 = vmatpush3.bf16.msra.mxu0 %v1861_v24 }
 0x10d   :  { %v1665_v32 = vpop.f32.mrb[0].mxu0 }
 0x10e   :  { %v225_v33 = vadd.f32 %v1665_v32, %v2278_v31  ;;  %v219_v35 = vpop.f32.mrb[1].mxu0 }
 0x10f   :  { %v220_v36 = vadd.f32 %v2278_v31, %v219_v35 }
 0x110   :  { %v299_v37 = vmax.f32 %v225_v33, 0.0 }
 0x111   :  { %v298_v38 = vmax.f32 %v220_v36, 0.0  ;;  %v1668_v39 = vpop.f32.mrb[2].mxu0 }
 0x112   :  { %v327_v40 = vrot.slane %v299_v37, %v2282_v34  ;;  %v235_v41 = vadd.f32 %v1668_v39, %v2278_v31  ;;  %v229_v42 = vpop.f32.mrb[3].mxu0 }
 0x113   :  { %v320_v43 = vrot.slane %v298_v38, %v2282_v34  ;;  %v230_v44 = vadd.f32 %v2278_v31, %v229_v42 }
 0x114   :  { %v443_v45 = vrot.slane %v327_v40, 4  ;;  %v301_v46 = vmax.f32 %v235_v41, 0.0 }
 0x115   :  { %v442_v47 = vrot.slane %v320_v43, 4  ;;  %v300_v48 = vmax.f32 %v230_v44, 0.0  ;;  %v1671_v49 = vpop.f32.mrb[4].mxu0 }
 0x116   :  { %v475_v50 = vmax.f32 %v327_v40, %v443_v45  ;;  %v341_v51 = vrot.slane %v301_v46, %v2282_v34  ;;  %v245_v52 = vadd.f32 %v1671_v49, %v2278_v31  ;;  %v239_v53 = vpop.f32.mrb[5].mxu0 }
 0x117   :  { %v474_v54 = vmax.f32 %v320_v43, %v442_v47  ;;  %v334_v55 = vrot.slane %v300_v48, %v2282_v34  ;;  %v240_v56 = vadd.f32 %v2278_v31, %v239_v53 }
 0x118   :  { %v445_v57 = vrot.slane %v341_v51, 4  ;;  %v303_v58 = vmax.f32 %v245_v52, 0.0 }
 0x119   :  { %v444_v59 = vrot.slane %v334_v55, 4  ;;  %v302_v60 = vmax.f32 %v240_v56, 0.0  ;;  %v1674_v61 = vpop.f32.mrb[6].mxu0  ;;  %v554_v62 = vcombine.low %v474_v54, %v475_v50 }
 0x11a   :  { %v477_v63 = vmax.f32 %v341_v51, %v445_v57  ;;  %v355_v0 = vrot.slane %v303_v58, %v2282_v34  ;;  %v255_v1 = vadd.f32 %v1674_v61, %v2278_v31  ;;  %v249_v2 = vpop.f32.mrb[7].mxu0 }
 0x11b   :  { %v476_v3 = vmax.f32 %v334_v55, %v444_v59  ;;  %v348_v4 = vrot.slane %v302_v60, %v2282_v34  ;;  %v250_v5 = vadd.f32 %v2278_v31, %v249_v2  ;;  %635 = vmatmul.mubr.f32.vlgmr.msra.gmra.mrb[0].mxu1 %v554_v62  ;;  %1719 = vmatprep.mubr.f32.mxu0 %v554_v62 }
 0x11c   :  { %v447_v6 = vrot.slane %v355_v0, 4  ;;  %v305_v7 = vmax.f32 %v255_v1, 0.0  ;;  %640 = vmatprep.mubr.f32.mxu1 %v2096_v25 }
 0x11d   :  { %v446_v8 = vrot.slane %v348_v4, 4  ;;  %v304_v9 = vmax.f32 %v250_v5, 0.0  ;;  %v1677_v10 = vpop.f32.mrb[8].mxu0  ;;  %v555_v11 = vcombine.low %v476_v3, %v477_v63 }
 0x11e   :  { %v479_v12 = vmax.f32 %v355_v0, %v447_v6  ;;  %v369_v13 = vrot.slane %v305_v7, %v2282_v34  ;;  %v265_v14 = vadd.f32 %v1677_v10, %v2278_v31  ;;  %v259_v15 = vpop.f32.mrb[9].mxu0 }
 0x11f   :  { %v478_v16 = vmax.f32 %v348_v4, %v446_v8  ;;  %v362_v17 = vrot.slane %v304_v9, %v2282_v34  ;;  %v260_v18 = vadd.f32 %v2278_v31, %v259_v15  ;;  %641 = vmatmul.mubr.f32.gmra.mrb[2].mxu1 %v555_v11  ;;  %1720 = vmatmul.mubr.f32.vlgmr.msra.gmra.mrb[16].mxu0 %v555_v11 }
 0x120   :  { %v449_v19 = vrot.slane %v369_v13, 4  ;;  %v307_v20 = vmax.f32 %v265_v14, 0.0  ;;  %646 = vmatprep.mubr.f32.mxu1 %v2096_v25  ;;  %v1113_v14 = vld [vmem:[#allocation5 + $0x180] sm:$0xff] }
 0x121   :  { %v448_v21 = vrot.slane %v362_v17, 4  ;;  %v306_v22 = vmax.f32 %v260_v18, 0.0  ;;  %v1680_v23 = vpop.f32.mrb[10].mxu0  ;;  %v556_v24 = vcombine.low %v478_v16, %v479_v12  ;;  %v1081_v12 = vld [vmem:[#allocation5 + $0x80] sm:$0xff]  ;;  %v1114_v18 = vld [vmem:[#allocation5 + $0x188] sm:$0xff] }
 0x122   :  { %v481_v26 = vmax.f32 %v369_v13, %v449_v19  ;;  %v383_v27 = vrot.slane %v307_v20, %v2282_v34  ;;  %v275_v28 = vadd.f32 %v1680_v23, %v2278_v31  ;;  %v269_v29 = vpop.f32.mrb[11].mxu0  ;;  %v1082_v13 = vld [vmem:[#allocation5 + $0x88] sm:$0xff]  ;;  %v1065_v16 = vld [vmem:[#allocation5] sm:$0xff]  ;;  %v1897_v20 = vpack.c.bf16 %v1114_v18, %v1113_v14 }
 0x123   :  { %v480_v32 = vmax.f32 %v362_v17, %v448_v21  ;;  %v376_v33 = vrot.slane %v306_v22, %v2282_v34  ;;  %v270_v35 = vadd.f32 %v2278_v31, %v269_v29  ;;  %647 = vmatmul.mubr.f32.gmra.mrb[4].mxu1 %v556_v24  ;;  %1722 = vmatprep.mubr.f32.mxu0 %v556_v24  ;;  %v1066_v17 = vld [vmem:[#allocation5 + $0x8] sm:$0xff]  ;;  %v1097_v21 = vld [vmem:[#allocation5 + $0x100] sm:$0xff]  ;;  %v1083_v24 = vld [vmem:[#allocation5 + $0x90] sm:$0xff] }
 0x124   :  { %v451_v36 = vrot.slane %v383_v27, 4  ;;  %v309_v37 = vmax.f32 %v275_v28, 0.0  ;;  %652 = vmatprep.mubr.f32.mxu1 %v2096_v25  ;;  %v1865_v15 = vpack.c.bf16 %v1082_v13, %v1081_v12  ;;  %v1867_v19 = vpack.c.bf16 %v1066_v17, %v1065_v16  ;;  %v1098_v22 = vld [vmem:[#allocation5 + $0x108] sm:$0xff]  ;;  %1898 = vmatprep.subr.bf16.mxu0 %v1897_v20  ;;  %v1067_v29 = vld [vmem:[#allocation5 + $0x10] sm:$0xff]  ;;  %v1092_v12 = vld [vmem:[#allocation5 + $0xd8] sm:$0xff] }
 0x125   :  { %v450_v38 = vrot.slane %v376_v33, 4  ;;  %v308_v39 = vmax.f32 %v270_v35, 0.0  ;;  %v1683_v40 = vpop.f32.mrb[12].mxu0  ;;  %v557_v41 = vcombine.low %v480_v32, %v481_v26  ;;  %v1899_v23 = vpack.c.bf16 %v1098_v22, %v1097_v21  ;;  %v1084_v26 = vld [vmem:[#allocation5 + $0x98] sm:$0xff]  ;;  %v1123_v13 = vld [vmem:[#allocation5 + $0x1d0] sm:$0xff] }
 0x126   :  { %v483_v42 = vmax.f32 %v383_v27, %v451_v36  ;;  %v397_v43 = vrot.slane %v309_v37, %v2282_v34  ;;  %v285_v44 = vadd.f32 %v1683_v40, %v2278_v31  ;;  %v279_v45 = vpop.f32.mrb[13].mxu0  ;;  %1866 = vmatprep.subr.bf16.mxu1 %v1865_v15  ;;  %v1115_v27 = vld [vmem:[#allocation5 + $0x190] sm:$0xff]  ;;  %v1869_v28 = vpack.c.bf16 %v1084_v26, %v1083_v24  ;;  %v1068_v32 = vld [vmem:[#allocation5 + $0x18] sm:$0xff]  ;;  %v1085_v40 = vld [vmem:[#allocation5 + $0xa0] sm:$0xff] }
 0x127   :  { %v482_v46 = vmax.f32 %v376_v33, %v450_v38  ;;  %v390_v47 = vrot.slane %v308_v39, %v2282_v34  ;;  %v280_v48 = vadd.f32 %v2278_v31, %v279_v45  ;;  %653 = vmatmul.mubr.f32.gmra.mrb[6].mxu1 %v557_v41  ;;  %1723 = vmatmul.mubr.f32.gmra.mrb[18].mxu0 %v557_v41  ;;  %v1116_v33 = vld [vmem:[#allocation5 + $0x198] sm:$0xff]  ;;  %v1099_v37 = vld [vmem:[#allocation5 + $0x110] sm:$0xff]  ;;  %v1086_v41 = vld [vmem:[#allocation5 + $0xa8] sm:$0xff] }
 0x128   :  { %v453_v49 = vrot.slane %v397_v43, 4  ;;  %v311_v50 = vmax.f32 %v285_v44, 0.0  ;;  %658 = vmatprep.mubr.f32.mxu1 %v2096_v25  ;;  %1868 = vmatpush3.bf16.msra.mxu1 %v1867_v19  ;;  %v1871_v35 = vpack.c.bf16 %v1068_v32, %v1067_v29  ;;  %v1901_v36 = vpack.c.bf16 %v1116_v33, %v1115_v27  ;;  %v1100_v38 = vld [vmem:[#allocation5 + $0x118] sm:$0xff]  ;;  %v1069_v44 = vld [vmem:[#allocation5 + $0x20] sm:$0xff]  ;;  %v1070_v45 = vld [vmem:[#allocation5 + $0x28] sm:$0xff] }
 0x129   :  { %v452_v51 = vrot.slane %v390_v47, 4  ;;  %v310_v52 = vmax.f32 %v280_v48, 0.0  ;;  %v1686_v53 = vpop.f32.mrb[14].mxu0  ;;  %v558_v54 = vcombine.low %v482_v46, %v483_v42  ;;  %1900 = vmatpush3.bf16.msra.mxu0 %v1899_v23  ;;  %1870 = vmatprep.subr.bf16.mxu1 %v1869_v28  ;;  %v1903_v39 = vpack.c.bf16 %v1100_v38, %v1099_v37  ;;  %v1117_v42 = vld [vmem:[#allocation5 + $0x1a0] sm:$0xff]  ;;  %v1118_v46 = vld [vmem:[#allocation5 + $0x1a8] sm:$0xff]  ;;  %v1075_v15 = vld [vmem:[#allocation5 + $0x50] sm:$0xff] }
 0x12a   :  { %v485_v55 = vmax.f32 %v397_v43, %v453_v49  ;;  %v411_v56 = vrot.slane %v311_v50, %v2282_v34  ;;  %v295_v57 = vadd.f32 %v1686_v53, %v2278_v31  ;;  %v289_v58 = vpop.f32.mrb[15].mxu0  ;;  %1902 = vmatprep.subr.bf16.mxu0 %v1901_v36  ;;  %v1873_v43 = vpack.c.bf16 %v1086_v41, %v1085_v40  ;;  %v1101_v49 = vld [vmem:[#allocation5 + $0x120] sm:$0xff]  ;;  %v1102_v50 = vld [vmem:[#allocation5 + $0x128] sm:$0xff]  ;;  %v1088_v53 = vld [vmem:[#allocation5 + $0xb8] sm:$0xff] }
 0x12b   :  { %v484_v59 = vmax.f32 %v390_v47, %v452_v51  ;;  %v404_v60 = vrot.slane %v310_v52, %v2282_v34  ;;  %v290_v61 = vadd.f32 %v2278_v31, %v289_v58  ;;  %659 = vmatmul.mubr.f32.gmra.mrb[8].mxu1 %v558_v54  ;;  %1725 = vmatprep.mubr.f32.mxu0 %v558_v54  ;;  %v1087_v52 = vld [vmem:[#allocation5 + $0xb0] sm:$0xff]  ;;  %v1120_v58 = vld [vmem:[#allocation5 + $0x1b8] sm:$0xff]  ;;  %v1093_v23 = vld [vmem:[#allocation5 + $0xe0] sm:$0xff] }
 0x12c   :  { %v455_v62 = vrot.slane %v411_v56, 4  ;;  %v313_v63 = vmax.f32 %v295_v57, 0.0  ;;  %664 = vmatprep.mubr.f32.mxu1 %v2096_v25  ;;  %1872 = vmatpush3.bf16.msra.mxu1 %v1871_v35  ;;  %v1875_v47 = vpack.c.bf16 %v1070_v45, %v1069_v44  ;;  %v1905_v48 = vpack.c.bf16 %v1118_v46, %v1117_v42  ;;  %v1119_v54 = vld [vmem:[#allocation5 + $0x1b0] sm:$0xff]  ;;  %v1072_v57 = vld [vmem:[#allocation5 + $0x38] sm:$0xff]  ;;  %v1094_v24 = vld [vmem:[#allocation5 + $0xe8] sm:$0xff] }
 0x12d   :  { %v454_v0 = vrot.slane %v404_v60, 4  ;;  %v312_v1 = vmax.f32 %v290_v61, 0.0  ;;  %v559_v2 = vcombine.low %v484_v59, %v485_v55  ;;  %1904 = vmatpush3.bf16.msra.mxu0 %v1903_v39  ;;  %1874 = vmatprep.subr.bf16.mxu1 %v1873_v43  ;;  %v1907_v51 = vpack.c.bf16 %v1102_v50, %v1101_v49  ;;  %v1103_v61 = vld [vmem:[#allocation5 + $0x130] sm:$0xff]  ;;  %v1076_v16 = vld [vmem:[#allocation5 + $0x58] sm:$0xff]  ;;  %v1077_v26 = vld [vmem:[#allocation5 + $0x60] sm:$0xff] }
 0x12e   :  { %v487_v3 = vmax.f32 %v411_v56, %v455_v62  ;;  %v425_v4 = vrot.slane %v313_v63, %v2282_v34  ;;  %1906 = vmatprep.subr.bf16.mxu0 %v1905_v48  ;;  %v1877_v55 = vpack.c.bf16 %v1088_v53, %v1087_v52  ;;  %v1071_v56 = vld [vmem:[#allocation5 + $0x30] sm:$0xff]  ;;  %v1104_v62 = vld [vmem:[#allocation5 + $0x138] sm:$0xff]  ;;  %v1887_v18 = vpack.c.bf16 %v1076_v16, %v1075_v15  ;;  %v1078_v28 = vld [vmem:[#allocation5 + $0x68] sm:$0xff] }
 0x12f   :  { %v486_v5 = vmax.f32 %v404_v60, %v454_v0  ;;  %v418_v6 = vrot.slane %v312_v1, %v2282_v34  ;;  %665 = vmatmul.mubr.f32.gmra.mrb[10].mxu1 %v559_v2  ;;  %1726 = vmatmul.mubr.f32.gmra.mrb[20].mxu0 %v559_v2  ;;  %v1879_v59 = vpack.c.bf16 %v1072_v57, %v1071_v56  ;;  %v1089_v0 = vld [vmem:[#allocation5 + $0xc0] sm:$0xff]  ;;  %v1090_v1 = vld [vmem:[#allocation5 + $0xc8] sm:$0xff]  ;;  %v1124_v17 = vld [vmem:[#allocation5 + $0x1d8] sm:$0xff] }
 0x130   :  { %v457_v7 = vrot.slane %v425_v4, 4  ;;  %670 = vmatprep.mubr.f32.mxu1 %v2096_v25  ;;  %1876 = vmatpush3.bf16.msra.mxu1 %v1875_v47  ;;  %v1909_v60 = vpack.c.bf16 %v1120_v58, %v1119_v54  ;;  %v1911_v63 = vpack.c.bf16 %v1104_v62, %v1103_v61  ;;  %v1121_v2 = vld [vmem:[#allocation5 + $0x1c0] sm:$0xff]  ;;  %v1917_v19 = vpack.c.bf16 %v1124_v17, %v1123_v13  ;;  %v1107_v20 = vld [vmem:[#allocation5 + $0x150] sm:$0xff]  ;;  %v1108_v21 = vld [vmem:[#allocation5 + $0x158] sm:$0xff] }
 0x131   :  { %v456_v31 = vrot.slane %v418_v6, 4  ;;  %v560_v8 = vcombine.low %v486_v5, %v487_v3  ;;  %1908 = vmatpush3.bf16.msra.mxu0 %v1907_v51  ;;  %1878 = vmatprep.subr.bf16.mxu1 %v1877_v55  ;;  %v1881_v3 = vpack.c.bf16 %v1090_v1, %v1089_v0  ;;  %v1074_v5 = vld [vmem:[#allocation5 + $0x48] sm:$0xff]  ;;  %v1919_v22 = vpack.c.bf16 %v1108_v21, %v1107_v20  ;;  %v1125_v29 = vld [vmem:[#allocation5 + $0x1e0] sm:$0xff]  ;;  %v1095_v38 = vld [vmem:[#allocation5 + $0xf0] sm:$0xff] }
 0x132   :  { %v489_v9 = vmax.f32 %v425_v4, %v457_v7  ;;  %1910 = vmatprep.subr.bf16.mxu0 %v1909_v60  ;;  %v1073_v4 = vld [vmem:[#allocation5 + $0x40] sm:$0xff]  ;;  %v1889_v27 = vpack.c.bf16 %v1094_v24, %v1093_v23  ;;  %v1126_v32 = vld [vmem:[#allocation5 + $0x1e8] sm:$0xff]  ;;  %v1891_v33 = vpack.c.bf16 %v1078_v28, %v1077_v26  ;;  %v1096_v40 = vld [vmem:[#allocation5 + $0xf8] sm:$0xff]  ;;  %v2098_v51 = vmov 0.0|0.0  }
 0x133   :  { %v488_v10 = vmax.f32 %v418_v6, %v456_v31  ;;  %671 = vmatmul.mubr.f32.gmra.mrb[12].mxu1 %v560_v8  ;;  %1728 = vmatprep.mubr.f32.mxu0 %v560_v8  ;;  %v1122_v6 = vld [vmem:[#allocation5 + $0x1c8] sm:$0xff]  ;;  %v1883_v7 = vpack.c.bf16 %v1074_v5, %v1073_v4  ;;  %v1105_v8 = vld [vmem:[#allocation5 + $0x140] sm:$0xff]  ;;  %v1921_v35 = vpack.c.bf16 %v1126_v32, %v1125_v29  ;;  %v1079_v41 = vld [vmem:[#allocation5 + $0x70] sm:$0xff] }
 0x134   :  { %676 = vmatprep.mubr.f32.mxu1 %v2096_v25  ;;  %1880 = vmatpush3.bf16.msra.mxu1 %v1879_v59  ;;  %v1913_v31 = vpack.c.bf16 %v1122_v6, %v1121_v2  ;;  %v1109_v36 = vld [vmem:[#allocation5 + $0x160] sm:$0xff]  ;;  %v1110_v37 = vld [vmem:[#allocation5 + $0x168] sm:$0xff]  ;;  %v1080_v42 = vld [vmem:[#allocation5 + $0x78] sm:$0xff]  ;;  %v1893_v43 = vpack.c.bf16 %v1096_v40, %v1095_v38 }
 0x135   :  { %v561_v11 = vcombine.low %v488_v10, %v489_v9  ;;  %1912 = vmatpush3.bf16.msra.mxu0 %v1911_v63  ;;  %v1106_v9 = vld [vmem:[#allocation5 + $0x148] sm:$0xff]  ;;  %1882 = vmatprep.subr.bf16.mxu1 %v1881_v3  ;;  %v1923_v39 = vpack.c.bf16 %v1110_v37, %v1109_v36  ;;  %v1895_v44 = vpack.c.bf16 %v1080_v42, %v1079_v41  ;;  %v1127_v45 = vld [vmem:[#allocation5 + $0x1f0] sm:$0xff]  ;;  %v1128_v46 = vld [vmem:[#allocation5 + $0x1f8] sm:$0xff] }
 0x136   :  { %v1915_v10 = vpack.c.bf16 %v1106_v9, %v1105_v8  ;;  %1914 = vmatprep.subr.bf16.mxu0 %v1913_v31  ;;  %v1111_v47 = vld [vmem:[#allocation5 + $0x170] sm:$0xff]  ;;  %v1925_v48 = vpack.c.bf16 %v1128_v46, %v1127_v45  ;;  %v1112_v49 = vld [vmem:[#allocation5 + $0x178] sm:$0xff]  ;;  %v2329_v2 = vld [vmem:[%s2452_s4] ss:$0 sm:$0xff] }
 0x137   :  { %677 = vmatmul.mubr.f32.gmra.mrb[14].mxu1 %v561_v11  ;;  %1729 = vmatmul.mubr.f32.gmra.mrb[22].mxu0 %v561_v11  ;;  %v1091_v11 = vld [vmem:[#allocation5 + $0xd0] sm:$0xff]  ;;  %v1927_v50 = vpack.c.bf16 %v1112_v49, %v1111_v47 }
 0x138   :  { %1884 = vmatpush3.bf16.msra.mxu1 %v1883_v7  ;;  %v1885_v14 = vpack.c.bf16 %v1092_v12, %v1091_v11 }
 0x139   :  { %1916 = vmatpush3.bf16.msra.mxu0 %v1915_v10 }
 0x13a   :  { %1886 = vmatprep.subr.bf16.mxu1 %v1885_v14  ;;  %1918 = vmatprep.subr.bf16.mxu0 %v1917_v19 }
 0x13c   :  { %1888 = vmatpush3.bf16.msra.mxu1 %v1887_v18 }
 0x13d   :  { %1920 = vmatpush3.bf16.msra.mxu0 %v1919_v22  ;;  %1890 = vmatprep.subr.bf16.mxu1 %v1889_v27 }
 0x13e   :  { %1922 = vmatprep.subr.bf16.mxu0 %v1921_v35  ;;  %v2099_v35 = vmov 1983009808  }
 0x13f   :  { %v983_v36 = vunpack.c.l.s4 %v2099_v35 }
 0x140   :  { %1892 = vmatpush3.bf16.msra.mxu1 %v1891_v33 }
 0x141   :  { %1924 = vmatpush3.bf16.msra.mxu0 %v1923_v39  ;;  %1894 = vmatprep.subr.bf16.mxu1 %v1893_v43 }
 0x142   :  { %1926 = vmatprep.subr.bf16.mxu0 %v1925_v48 }
 0x144   :  { %1896 = vmatpush3.bf16.msra.mxu1 %v1895_v44 }
 0x145   :  { %1928 = vmatpush3.bf16.msra.mxu0 %v1927_v50  ;;  %1929 = vmatprep.subr.bf16.mxu1 %v2098_v51 }
 0x146   :  { %1953 = vmatprep.subr.bf16.mxu0 %v2098_v51 }
 0x1ee   :  { %v636_v52 = vpop.f32.mrb[0].mxu1 }
 0x1ef   :  { %v796_v53 = vrot.slane %v636_v52, 7  ;;  %v638_v54 = vpop.f32.mrb[1].mxu1 }
 0x1f1   :  { %v813_v55 = vsel %vm812_vm1, 0.0, %v796_v53  ;;  %v984_v53 = vunpack.c.0.s8 %v983_v36 }
 0x1f2   :  { %v854_v56 = vadd.f32 %v813_v55, %v638_v54  ;;  %v642_v57 = vpop.f32.mrb[2].mxu1  ;;  %v1721_v58 = vpop.f32.mrb[16].mxu0 }
 0x1f3   :  { %v797_v59 = vrot.slane %v642_v57, 7  ;;  %v830_v60 = vrot.slane %v1721_v58, 1  ;;  %v644_v61 = vpop.f32.mrb[3].mxu1  ;;  %v749_v62 = vpop.f32.mrb[17].mxu0 }
 0x1f4   :  { %v829_v63 = vrot.slane %v749_v62, 1 }
 0x1f5   :  { %v814_v0 = vsel %vm812_vm1, 0.0, %v797_v59  ;;  %v847_v5 = vsel %vm845_vm2, %v830_v60, 0.0 }
 0x1f6   :  { %v855_v1 = vadd.f32 %v814_v0, %v644_v61  ;;  %v846_v3 = vsel %vm845_vm2, %v829_v63, 0.0  ;;  %v648_v4 = vpop.f32.mrb[4].mxu1 }
 0x1f7   :  { %v862_v6 = vadd.f32 %v854_v56, %v846_v3  ;;  %v798_v7 = vrot.slane %v648_v4, 7  ;;  %v650_v31 = vpop.f32.mrb[5].mxu1 }
 0x1f8   :  { %v863_v8 = vadd.f32 %v855_v1, %v847_v5 }
 0x1f9   :  { %v877_v9 = vadd.f32 %v2329_v2, %v862_v6  ;;  %v815_v10 = vsel %vm812_vm1, 0.0, %v798_v7  ;;  %v987_v6 = vsub.s32 %v984_v53, %v2273_v30 }
 0x1fa   :  { %v878_v11 = vadd.f32 %v2329_v2, %v863_v8  ;;  %v856_v12 = vadd.f32 %v815_v10, %v650_v31  ;;  %v654_v13 = vpop.f32.mrb[6].mxu1  ;;  %v1724_v14 = vpop.f32.mrb[18].mxu0 }
 0x1fb   :  { %v799_v15 = vrot.slane %v654_v13, 7  ;;  %v832_v16 = vrot.slane %v1724_v14, 1  ;;  %v656_v17 = vpop.f32.mrb[7].mxu1  ;;  %v759_v18 = vpop.f32.mrb[19].mxu0  ;;  %v885_v20 = vmax.f32 %v877_v9, 0.0 }
 0x1fc   :  { %v831_v19 = vrot.slane %v759_v18, 1  ;;  %v886_v22 = vmax.f32 %v878_v11, 0.0 }
 0x1fd   :  { %v816_v21 = vsel %vm812_vm1, 0.0, %v799_v15  ;;  %v849_v27 = vsel %vm845_vm2, %v832_v16, 0.0  ;;  %v899_v37 = vrot.slane %v885_v20, %v2282_v34 }
 0x1fe   :  { %v857_v23 = vadd.f32 %v816_v21, %v656_v17  ;;  %v848_v24 = vsel %vm845_vm2, %v831_v19, 0.0  ;;  %v660_v26 = vpop.f32.mrb[8].mxu1  ;;  %v906_v40 = vrot.slane %v886_v22, %v2282_v34 }
 0x1ff   :  { %v864_v28 = vadd.f32 %v856_v12, %v848_v24  ;;  %v800_v29 = vrot.slane %v660_v26, 7  ;;  %v662_v32 = vpop.f32.mrb[9].mxu1  ;;  %v957_v54 = vrot.slane %v899_v37, 4 }
 0x200   :  { %v865_v33 = vadd.f32 %v857_v23, %v849_v27  ;;  %v958_v57 = vrot.slane %v906_v40, 4 }
 0x201   :  { %v879_v38 = vadd.f32 %v2329_v2, %v864_v28  ;;  %v817_v39 = vsel %vm812_vm1, 0.0, %v800_v29  ;;  %v973_v7 = vmax.f32 %v899_v37, %v957_v54 }
 0x202   :  { %v880_v41 = vadd.f32 %v2329_v2, %v865_v33  ;;  %v858_v42 = vadd.f32 %v817_v39, %v662_v32  ;;  %v666_v43 = vpop.f32.mrb[10].mxu1  ;;  %v1727_v44 = vpop.f32.mrb[20].mxu0  ;;  %v974_v10 = vmax.f32 %v906_v40, %v958_v57 }
 0x203   :  { %v887_v45 = vmax.f32 %v879_v38, 0.0  ;;  %v801_v46 = vrot.slane %v666_v43, 7  ;;  %v834_v47 = vrot.slane %v1727_v44, 1  ;;  %v668_v48 = vpop.f32.mrb[11].mxu1  ;;  %v769_v49 = vpop.f32.mrb[21].mxu0 }
 0x204   :  { %v888_v50 = vmax.f32 %v880_v41, 0.0  ;;  %v833_v52 = vrot.slane %v769_v49, 1  ;;  %v2100_v49 = vmov 1934713408  }
 0x205   :  { %v913_v55 = vrot.slane %v887_v45, %v2282_v34  ;;  %v818_v56 = vsel %vm812_vm1, 0.0, %v801_v46  ;;  %v851_v63 = vsel %vm845_vm2, %v834_v47, 0.0 }
 0x206   :  { %v920_v58 = vrot.slane %v888_v50, %v2282_v34  ;;  %v859_v59 = vadd.f32 %v818_v56, %v668_v48  ;;  %v850_v60 = vsel %vm845_vm2, %v833_v52, 0.0  ;;  %v672_v61 = vpop.f32.mrb[12].mxu1  ;;  %v1000_v50 = vunpack.c.l.s4 %v2100_v49 }
 0x207   :  { %v959_v62 = vrot.slane %v913_v55, 4  ;;  %v866_v0 = vadd.f32 %v858_v42, %v850_v60  ;;  %v802_v1 = vrot.slane %v672_v61, 7  ;;  %v674_v3 = vpop.f32.mrb[13].mxu1 }
 0x208   :  { %v960_v4 = vrot.slane %v920_v58, 4  ;;  %v867_v5 = vadd.f32 %v859_v59, %v851_v63 }
 0x209   :  { %v975_v31 = vmax.f32 %v913_v55, %v959_v62  ;;  %v881_v8 = vadd.f32 %v2329_v2, %v866_v0  ;;  %v819_v9 = vsel %vm812_vm1, 0.0, %v802_v1  ;;  %v1283_v1 = vld [vmem:[%s2455_s7 + $0x8] sm:$0xff] }
 0x20a   :  { %v976_v11 = vmax.f32 %v920_v58, %v960_v4  ;;  %v882_v12 = vadd.f32 %v2329_v2, %v867_v5  ;;  %v860_v13 = vadd.f32 %v819_v9, %v674_v3  ;;  %v678_v14 = vpop.f32.mrb[14].mxu1  ;;  %v1730_v15 = vpop.f32.mrb[22].mxu0  ;;  %v1001_v58 = vunpack.c.0.s8 %v1000_v50 }
 0x20b   :  { %v803_v16 = vrot.slane %v678_v14, 7  ;;  %v836_v17 = vrot.slane %v1730_v15, 1  ;;  %v680_v18 = vpop.f32.mrb[15].mxu1  ;;  %v779_v19 = vpop.f32.mrb[23].mxu0  ;;  %v981_v20 = vcombine.low %v973_v7, %v975_v31  ;;  %v889_v23 = vmax.f32 %v881_v8, 0.0  ;;  %v1287_v14 = vld [vmem:[%s2455_s7 + $0x28] sm:$0xff] }
 0x20c   :  { %v989_v21 = vcombine.low %v974_v10, %v976_v11  ;;  %v835_v22 = vrot.slane %v779_v19, 1  ;;  %v890_v27 = vmax.f32 %v882_v12, 0.0  ;;  %v1004_v61 = vsub.s32 %v1001_v58, %v2273_v30  ;;  %v1285_v11 = vld [vmem:[%s2455_s7 + $0x18] sm:$0xff]  ;;  %v1290_v19 = vld [vmem:[%s2455_s7 + $0x40] sm:$0xff]  ;;  %v1387_v58 = vld [vmem:[#allocation7 + $0x30] sm:$0xff] }
 0x20d   :  { %v820_v24 = vsel %vm812_vm1, 0.0, %v803_v16  ;;  %v988_v26 = vrot.slane %v981_v20, %v987_v6  ;;  %v853_v33 = vsel %vm845_vm2, %v836_v17, 0.0  ;;  %v927_v39 = vrot.slane %v889_v23, %v2282_v34  ;;  %v1288_v16 = vld [vmem:[%s2455_s7 + $0x30] sm:$0xff]  ;;  %v1289_v17 = vld [vmem:[%s2455_s7 + $0x38] sm:$0xff]  ;;  %v1291_v20 = vld [vmem:[%s2455_s7 + $0x48] sm:$0xff] }
 0x20e   :  { %v861_v28 = vadd.f32 %v820_v24, %v680_v18  ;;  %v852_v29 = vsel %vm845_vm2, %v835_v22, 0.0  ;;  %v996_v32 = vrot.slane %v989_v21, %v987_v6  ;;  %v934_v41 = vrot.slane %v890_v27, %v2282_v34  ;;  %v1292_v22 = vld [vmem:[%s2455_s7 + $0x50] sm:$0xff]  ;;  %v1293_v23 = vld [vmem:[%s2455_s7 + $0x58] sm:$0xff]  ;;  %v1294_v24 = vld [vmem:[%s2455_s7 + $0x60] sm:$0xff] }
 0x20f   :  { %v868_v35 = vadd.f32 %v860_v13, %v852_v29  ;;  %v961_v45 = vrot.slane %v927_v39, 4  ;;  %v1286_v13 = vld [vmem:[%s2455_s7 + $0x20] sm:$0xff]  ;;  %v1939_v18 = vpack.c.bf16 %v1289_v17, %v1288_v16  ;;  %v1942_v21 = vpack.c.bf16 %v1291_v20, %v1290_v19  ;;  %v1295_v27 = vld [vmem:[%s2455_s7 + $0x68] sm:$0xff]  ;;  %v1296_v29 = vld [vmem:[%s2455_s7 + $0x70] sm:$0xff] }
 0x210   :  { %v869_v36 = vadd.f32 %v861_v28, %v853_v33  ;;  %v997_v37 = vcombine.low %v988_v26, %v996_v32  ;;  %v998_v38 = vcombine.high %v988_v26, %v996_v32  ;;  %v962_v47 = vrot.slane %v934_v41, 4  ;;  %v1297_v32 = vld [vmem:[%s2455_s7 + $0x78] sm:$0xff] }
 0x211   :  { %v883_v40 = vadd.f32 %v2329_v2, %v868_v35  ;;  %v977_v54 = vmax.f32 %v927_v39, %v961_v45  ;;  %v1936_v15 = vpack.c.bf16 %v1287_v14, %v1286_v13  ;;  %v1945_v26 = vpack.c.bf16 %v1293_v23, %v1292_v22  ;;  %v1381_v35 = vld [vmem:[#allocation7] sm:$0xff] }
 0x212   :  { %v884_v42 = vadd.f32 %v2329_v2, %v869_v36  ;;  %v978_v56 = vmax.f32 %v934_v41, %v962_v47  ;;  %v1005_v3 = vrot.slane %v997_v37, %v1004_v61  ;;  %v1012_v5 = vrot.slane %v998_v38, %v1004_v61  ;;  %v1382_v36 = vld [vmem:[#allocation7 + $0x8] sm:$0xff]  ;;  %v1384_v38 = vld [vmem:[#allocation7 + $0x18] sm:$0xff]  ;;  %v1511_v45 = vld [vmem:[%s2454_s6] ss:$0 sm:$0xff] }
 0x213   :  { %v891_v43 = vmax.f32 %v883_v40, 0.0  ;;  %v1948_v28 = vpack.c.bf16 %v1295_v27, %v1294_v24  ;;  %v1951_v33 = vpack.c.bf16 %v1297_v32, %v1296_v29  ;;  %v1954_v37 = vpack.c.bf16 %v1382_v36, %v1381_v35  ;;  %v1385_v40 = vld [vmem:[#allocation7 + $0x20] sm:$0xff]  ;;  %v1386_v41 = vld [vmem:[#allocation7 + $0x28] sm:$0xff] }
 0x214   :  { %v892_v44 = vmax.f32 %v884_v42, 0.0  ;;  %v1960_v42 = vpack.c.bf16 %v1386_v41, %v1385_v40 }
 0x215   :  { %v941_v46 = vrot.slane %v891_v43, %v2282_v34 }
 0x216   :  { %v948_v48 = vrot.slane %v892_v44, %v2282_v34  ;;  %v1282_v34 = vld [vmem:[%s2455_s7] sm:$0xff] }
 0x217   :  { %v963_v52 = vrot.slane %v941_v46, 4  ;;  %v1930_v31 = vpack.c.bf16 %v1283_v1, %v1282_v34  ;;  %v1393_v34 = vld [vmem:[#allocation7 + $0x60] sm:$0xff] }
 0x218   :  { %v964_v53 = vrot.slane %v948_v48, 4 }
 0x219   :  { %v979_v55 = vmax.f32 %v941_v46, %v963_v52 }
 0x21a   :  { %v980_v57 = vmax.f32 %v948_v48, %v964_v53 }
 0x21b   :  { %v1015_v59 = vcombine.low %v977_v54, %v979_v55 }
 0x21c   :  { %v1023_v60 = vcombine.low %v978_v56, %v980_v57 }
 0x21d   :  { %v1022_v2 = vrot.slane %v1015_v59, %v987_v6  ;;  %v1388_v59 = vld [vmem:[#allocation7 + $0x38] sm:$0xff] }
 0x21e   :  { %v1030_v62 = vrot.slane %v1023_v60, %v987_v6  ;;  %v1284_v6 = vld [vmem:[%s2455_s7 + $0x10] sm:$0xff]  ;;  %v1963_v60 = vpack.c.bf16 %v1388_v59, %v1387_v58 }
 0x21f   :  { %v1933_v12 = vpack.c.bf16 %v1285_v11, %v1284_v6 }
 0x220   :  { %v1031_v63 = vcombine.low %v1022_v2, %v1030_v62  ;;  %v1032_v0 = vcombine.high %v1022_v2, %v1030_v62  ;;  %v1389_v2 = vld [vmem:[#allocation7 + $0x40] sm:$0xff] }
 0x222   :  { %v1039_v4 = vrot.slane %v1031_v63, %v1004_v61  ;;  %v1046_v7 = vrot.slane %v1032_v0, %v1004_v61  ;;  %v1390_v61 = vld [vmem:[#allocation7 + $0x48] sm:$0xff]  ;;  %v1391_v63 = vld [vmem:[#allocation7 + $0x50] sm:$0xff]  ;;  %v1392_v0 = vld [vmem:[#allocation7 + $0x58] sm:$0xff] }
 0x223   :  { %v1966_v62 = vpack.c.bf16 %v1390_v61, %v1389_v2  ;;  %v1969_v1 = vpack.c.bf16 %v1392_v0, %v1391_v63 }
 0x224   :  { %v1051_v8 = vcombine.low %v1005_v3, %v1039_v4  ;;  %v1509_v9 = vcombine.high %v1005_v3, %v1039_v4  ;;  %v1059_v10 = vcombine.low %v1012_v5, %v1046_v7  ;;  %v1510_v30 = vcombine.high %v1012_v5, %v1046_v7  ;;  %v1394_v3 = vld [vmem:[#allocation7 + $0x68] sm:$0xff]  ;;  %v1395_v5 = vld [vmem:[#allocation7 + $0x70] sm:$0xff]  ;;  %v1396_v7 = vld [vmem:[#allocation7 + $0x78] sm:$0xff] }
 0x225   :  { %v1972_v4 = vpack.c.bf16 %v1394_v3, %v1393_v34 }
 0x226   :  { %1200 = vmatprep.mubr.f32.mxu1 %v1509_v9  ;;  %1270 = vmatprep.mubr.f32.mxu0 %v1510_v30 }
 0x227   :  { %1201 = vmatmul.mubr.f32.vlgmr.msra.gmra.mrb[16].mxu1 %v1051_v8  ;;  %1271 = vmatmul.mubr.f32.vlgmr.msra.gmra.mrb[24].mxu0 %v1059_v10  ;;  %v1513_v8 = vld [vmem:[%s2456_s8] ss:$0 sm:$0xff]  ;;  %s2061_s8 = scalar_lea.vmem %s1482_s20, 128 }
 0x228   :  { %1931 = vmatpush3.bf16.msra.mxu1 %v1930_v31  ;;  %1763 = vmatprep.mubr.msk.f32.mxu1 %vm2101_vm3, %v2096_v25  ;;  %v1975_v31 = vpack.c.bf16 %v1396_v7, %v1395_v5  ;;  %p2062_p10 = scmp.ne.s32.totalorder %s1482_s20, %s2061_s8  ;;  %p2067_p12 = scmp.lt.s32.totalorder %s2061_s8, %s2061_s8 }
 0x229   :  { %1932 = vmatprep.subr.bf16.mxu1 %v2098_v51  ;;  %1798 = vmatprep.mubr.msk.f32.mxu0 %vm2101_vm3, %v2096_v25  ;;  %v1383_v25 = vld [vmem:[#allocation7 + $0x10] sm:$0xff] }
 0x22a   :  { %1955 = vmatpush3.bf16.msra.mxu0 %v1954_v37  ;;  %v1957_v39 = vpack.c.bf16 %v1384_v38, %v1383_v25  ;;  %p2068_p13 = por %p2067_p12, %p2066_p11 }
 0x22b   :  { %1956 = vmatprep.subr.bf16.mxu0 %v2098_v51 }
 0x22c   :  { %1934 = vmatpush3.bf16.msra.mxu1 %v1933_v12  ;;  %p2069_p0 = pnand %p2068_p13, %p2062_p10 }
 0x22d   :  { %1935 = vmatprep.subr.bf16.mxu1 %v2098_v51 }
 0x22e   :  { %1958 = vmatpush3.bf16.msra.mxu0 %v1957_v39 }
 0x22f   :  { %1959 = vmatprep.subr.bf16.mxu0 %v2098_v51 }
 0x230   :  { %1937 = vmatpush3.bf16.msra.mxu1 %v1936_v15 }
 0x231   :  { %1938 = vmatprep.subr.bf16.mxu1 %v2098_v51 }
 0x232   :  { %1961 = vmatpush3.bf16.msra.mxu0 %v1960_v42 }
 0x233   :  { %1962 = vmatprep.subr.bf16.mxu0 %v2098_v51 }
 0x234   :  { %1940 = vmatpush3.bf16.msra.mxu1 %v1939_v18 }
 0x235   :  { %1941 = vmatprep.subr.bf16.mxu1 %v2098_v51 }
 0x236   :  { %1964 = vmatpush3.bf16.msra.mxu0 %v1963_v60 }
 0x237   :  { %1965 = vmatprep.subr.bf16.mxu0 %v2098_v51 }
 0x238   :  { %1943 = vmatpush3.bf16.msra.mxu1 %v1942_v21 }
 0x239   :  { %1944 = vmatprep.subr.bf16.mxu1 %v2098_v51 }
 0x23a   :  { %1967 = vmatpush3.bf16.msra.mxu0 %v1966_v62 }
 0x23b   :  { %1968 = vmatprep.subr.bf16.mxu0 %v2098_v51 }
 0x23c   :  { %1946 = vmatpush3.bf16.msra.mxu1 %v1945_v26 }
 0x23d   :  { %1947 = vmatprep.subr.bf16.mxu1 %v2098_v51 }
 0x23e   :  { %1970 = vmatpush3.bf16.msra.mxu0 %v1969_v1 }
 0x23f   :  { %1971 = vmatprep.subr.bf16.mxu0 %v2098_v51 }
 0x240   :  { %1949 = vmatpush3.bf16.msra.mxu1 %v1948_v28 }
 0x241   :  { %1950 = vmatprep.subr.bf16.mxu1 %v2098_v51 }
 0x242   :  { %1973 = vmatpush3.bf16.msra.mxu0 %v1972_v4 }
 0x243   :  { %1974 = vmatprep.subr.bf16.mxu0 %v2098_v51  ;;  %v1515_v51 = vld [vmem:[%s2458_s10] ss:$0 sm:$0xff] }
 0x244   :  { %1952 = vmatpush3.bf16.msra.mxu1 %v1951_v33 }
 0x246   :  { %1976 = vmatpush3.bf16.msra.mxu0 %v1975_v31 }
 0x2fa   :  { %v1589_v43 = vpop.f32.mrb[16].mxu1  ;;  %v1624_v44 = vpop.f32.mrb[24].mxu0 }
 0x2fb   :  { %v1590_v46 = vpop.f32.mrb[17].mxu1  ;;  %v1625_v47 = vpop.f32.mrb[25].mxu0 }
 0x2fc   :  { %v1591_v48 = vadd.f32 %v1590_v46, %v1589_v43  ;;  %v1626_v49 = vadd.f32 %v1625_v47, %v1624_v44 }
 0x2fe   :  { %v1203_v50 = vadd.f32 %v1591_v48, %v1511_v45 }
 0x300   :  { %v1273_v52 = vadd.f32 %v1626_v49, %v1203_v50 }
 0x302   :  { %v1277_v53 = vmin.f32 %v1273_v52, 0.0  ;;  %vm1276_vm4 = vcmp.gt.f32.partialorder %v1273_v52, 0.0 }
 0x304   :  { %v1278_v54 = vmul.f32 1.442695, %v1277_v53 }
 0x306   :  { %1991 = vpow2.f32 %v1278_v54 }
 0x310   :  { %v1992_v55 = vpop.eup %1991 }
 0x311   :  { %v1512_v56 = vadd.f32 -1.0, %v1992_v55 }
 0x313   :  { %v1281_v57 = vsel %vm1276_vm4, %v1273_v52, %v1512_v56 }
 0x314   :  { %1764 = vmatmul.mubr.f32.vlgmr.msra.gmra.mrb[18].mxu1 %v1281_v57 }
 0x3e7   :  { %v1371_v9 = vpop.f32.mrb[18].mxu1 }
 0x3e8   :  { %v1372_v10 = vadd.f32 %v1513_v8, %v1371_v9  ;;  %v1765_v30 = vpop.f32.mrb[19].mxu1 }
 0x3ea   :  { %v1376_v6 = vmin.f32 %v1372_v10, 0.0  ;;  %vm1375_vm5 = vcmp.gt.f32.partialorder %v1372_v10, 0.0 }
 0x3ec   :  { %v1377_v11 = vmul.f32 1.442695, %v1376_v6 }
 0x3ee   :  { %1993 = vpow2.f32 %v1377_v11 }
 0x3f8   :  { %v1994_v12 = vpop.eup %1993 }
 0x3f9   :  { %v1514_v13 = vadd.f32 -1.0, %v1994_v12 }
 0x3fb   :  { %v1380_v14 = vsel %vm1375_vm5, %v1372_v10, %v1514_v13 }
 0x3fc   :  { %1799 = vmatmul.mubr.f32.vlgmr.msra.gmra.mrb[26].mxu0 %v1380_v14 }
 0x4cf   :  { %v1470_v15 = vpop.f32.mrb[26].mxu0 }
 0x4d0   :  { %v1471_v16 = vadd.f32 %v1515_v51, %v1470_v15  ;;  %v1800_v17 = vpop.f32.mrb[27].mxu0 }
 0x4d2   :  { %1474 = vst [vmem:[#allocation8] sm:$0xff] %v1471_v16 }
 0x4d3   :  { %2072 = shalt.err (!%p2069_p0)
}
 0x4d4   :  { %s2073_s5 = scalar_lea.hbm %s2459_s11, 128 }
 0x4d5   :  { %p2074_p1 = scmp.ne.s32.totalorder %s2459_s11, %s2073_s5  ;;  %p2077_p2 = scmp.lt.u32.totalorder %s2073_s5, %s2459_s11 }
 0x4d7   :  { %p2079_p3 = pnand %p2077_p2, %p2074_p1 }
 0x4d9   :  { %2082 = shalt.err (!%p2079_p3)
}
 0x4da   :  { %1484 = dma.vmem_to_hbm [thread:$0]  %s1482_s20, 128, %s2459_s11, [#allocation4]  }
 0x4db   :  { %2087 = dma.done.wait [#allocation4], 128  }
 0x4dc   :  { %2088 = vsyncadd [#allocation4], 4294967168 }
 0x4dd   :  { %1488 = vsyncpa [#allocation3], 1 }
 0x4de   :  { %1489 = vsyncpa [#allocation6], 1 }
 0x4df   :  { %1490 = vsyncpa [#allocation4], 1 }

</bundles_post_ra>
